<compile_context>
chip_gen: v7x
topology: tpu7x:2x2x1
jax: 0.10.0
libtpu: 0.0.40
codegen_flags: <defaults>
</compile_context>

<pallas_src>
import jax
import jax.numpy as jnp
from jax.experimental import pallas as pl
from jax.experimental.pallas import tpu as pltpu


def _sigmoid_mul_kernel(s_ref, x_ref, o_ref, gate_ref):
    # s_ref   : (TC, 1)   gate logits (VMEM-resident across the spatial axis)
    # x_ref   : (TC, THW) activation tile
    # o_ref   : (TC, THW) output tile
    # gate_ref: (TC, 1)   scratch: sigmoid(gate) for the current channel block
    @pl.when(pl.program_id(1) == 0)
    def _():
        # Sigmoid on the EUP in f32; cast once, reused for every spatial tile.
        gate_ref[...] = jax.nn.sigmoid(
            s_ref[...].astype(jnp.float32)).astype(gate_ref.dtype)

    # Multiply in the activation's native dtype (bf16 stays 2 B/elem on VPU).
    o_ref[...] = (x_ref[...] * gate_ref[...]).astype(o_ref.dtype)


def _pick_tiles(nc, hw, itemsize):
    """Pick (channel_tile, spatial_tile) for the (NC, HW) view.

    Spatial (lane) axis: full extent when modest (always a legal block dim),
    otherwise a lane-dense multiple of 128.
    Channel (sublane) axis: dtype-native sublane multiple, ~4 MiB activation
    tile, and capped so the channel grid axis has >= 2 blocks (both v7x
    TensorCores get work even when the tensor would fit in one block).
    """
    sub = max(8, 32 // itemsize)      # 8 for f32, 16 for bf16/fp16, 32 for int8/fp8

    if hw <= 2048:
        thw = hw                      # full extent -> always a legal block dim
    else:
        thw = 2048                    # lane-dense multiple of 128

    target_bytes = 4 << 20            # ~4 MiB activation tile
    tc = target_bytes // max(1, thw * itemsize)
    tc = max(sub, (tc // sub) * sub)  # dtype-native sublane multiple
    tc = min(tc, nc)                  # full extent if the tensor is small

    # Keep >= 2 channel blocks whenever feasible so megacore can shard them.
    if nc >= 2 * sub:
        half = (((nc + 1) // 2 + sub - 1) // sub) * sub
        tc = min(tc, half)
    return tc, thw


def sigmoid_mul(x587, x583):
    """sigmoid(x587) * x583;  x587: [N, C, 1, 1], x583: [N, C, H, W]."""
    n, c, h, w = x583.shape
    assert x587.shape == (n, c, 1, 1)

    nc, hw = n * c, h * w
    # Contiguous row-major dim collapses -> bitcasts, no relayout copies.
    s2d = x587.reshape(nc, 1)
    x2d = x583.reshape(nc, hw)

    itemsize = int(jnp.dtype(x583.dtype).itemsize)
    tc, thw = _pick_tiles(nc, hw, itemsize)
    grid = (pl.cdiv(nc, tc), pl.cdiv(hw, thw))

    # Explicit VMEM budget: double-buffered input + output activation tiles,
    # plus the tiny gate tile / scratch, plus headroom for compiler internals.
    tile_bytes = tc * thw * itemsize
    vmem_limit = int(min(4 * tile_bytes + (6 << 20), 48 << 20))

    cost = pl.CostEstimate(
        flops=nc * hw,
        transcendentals=nc,
        bytes_accessed=(2 * nc * hw + nc) * itemsize,
    )

    out2d = pl.pallas_call(
        _sigmoid_mul_kernel,
        out_shape=jax.ShapeDtypeStruct((nc, hw), x583.dtype),
        grid_spec=pltpu.PrefetchScalarGridSpec(
            num_scalar_prefetch=0,
            grid=grid,
            in_specs=[
                pl.BlockSpec((tc, 1), lambda i, j: (i, 0)),    # gate (resident over j)
                pl.BlockSpec((tc, thw), lambda i, j: (i, j)),  # activations
            ],
            out_specs=pl.BlockSpec((tc, thw), lambda i, j: (i, j)),
            scratch_shapes=[pltpu.VMEM((tc, 1), x583.dtype)],  # cached sigmoid(gate)
        ),
        compiler_params=pltpu.CompilerParams(
            # Channel axis parallel (megacore sharding on v7x); spatial axis
            # arbitrary so each core starts at j == 0 and the gate cache under
            # @pl.when(j == 0) is always valid.
            dimension_semantics=("parallel", "arbitrary"),
            vmem_limit_bytes=vmem_limit,
        ),
        cost_estimate=cost,
    )(s2d, x2d)

    return out2d.reshape(n, c, h, w)


if __name__ == "__main__":
    key = jax.random.PRNGKey(0)
    k1, k2, k3, k4 = jax.random.split(key, 4)

    # 1) The module's actual SE-block shape: [1, 1344, 7, 7] gated by [1, 1344, 1, 1].
    #    With the v7x-friendly channel split this now runs as grid=(2, 1).
    N, C, H, W = 1, 1344, 7, 7
    x583 = jax.random.normal(k1, (N, C, H, W), dtype=jnp.float32)
    x587 = jax.random.normal(k2, (N, C, 1, 1), dtype=jnp.float32)

    out = jax.block_until_ready(sigmoid_mul(x587, x583))
    ref = jax.nn.sigmoid(x587) * x583
    assert out.shape == ref.shape
    assert jnp.allclose(out, ref, atol=1e-6, rtol=1e-6)

    # 2) A larger spatial case exercising the gridded / pipelined path
    #    (channel split + partial block on the lane grid axis).
    N2, C2, H2, W2 = 2, 96, 48, 48
    y = jax.random.normal(k3, (N2, C2, H2, W2), dtype=jnp.float32)
    g = jax.random.normal(k4, (N2, C2, 1, 1), dtype=jnp.float32)

    out2 = jax.block_until_ready(sigmoid_mul(g, y))
    ref2 = jax.nn.sigmoid(g) * y
    assert out2.shape == ref2.shape
    assert jnp.allclose(out2, ref2, atol=1e-6, rtol=1e-6)

    print("KERNEL_OK")
</pallas_src>

<mosaic_0001>
module attributes {stable_mosaic.version = 11 : i64} {
  func.func @_sigmoid_mul_kernel(%arg0: i32, %arg1: i32, %arg2: memref<672x1xf32, #tpu.memory_space<vmem>>, %arg3: memref<672x49xf32, #tpu.memory_space<vmem>>, %arg4: memref<672x49xf32, #tpu.memory_space<vmem>>, %arg5: memref<672x1xf32, #tpu.memory_space<vmem>>) attributes {dimension_semantics = [#tpu.dimension_semantics<parallel>, #tpu.dimension_semantics<arbitrary>], iteration_bounds = array<i64: 2, 1>, scalar_prefetch = 0 : i64, scratch_operands = 1 : i64, tpu.core_type = #tpu.core_type<tc>, window_params = [{transform_indices = @transform_0, window_bounds = array<i64: 672, 1>}, {transform_indices = @transform_1, window_bounds = array<i64: 672, 49>}, {transform_indices = @transform_2, window_bounds = array<i64: 672, 49>}]} {
    %c0_i32 = arith.constant 0 : i32
    %0 = arith.cmpi eq, %arg1, %c0_i32 : i32
    %1 = arith.extui %0 : i1 to i32
    %c0_i32_0 = arith.constant 0 : i32
    %2 = arith.cmpi ne, %1, %c0_i32_0 : i32
    scf.if %2 {
      %c0_6 = arith.constant 0 : index
      %c0_7 = arith.constant 0 : index
      %8 = vector.load %arg2[%c0_6, %c0_7] : memref<672x1xf32, #tpu.memory_space<vmem>>, vector<672x1xf32>
      %9 = arith.negf %8 : vector<672x1xf32>
      %10 = math.exp %9 : vector<672x1xf32>
      %cst = arith.constant 1.000000e+00 : f32
      %11 = vector.broadcast %cst : f32 to vector<672x1xf32>
      %12 = arith.addf %11, %10 : vector<672x1xf32>
      %13 = arith.divf %11, %12 : vector<672x1xf32>
      %c0_8 = arith.constant 0 : index
      %c0_9 = arith.constant 0 : index
      %14 = vector.load %arg5[%c0_8, %c0_9] : memref<672x1xf32, #tpu.memory_space<vmem>>, vector<672x1xf32>
      tpu.vector_store %arg5[%c0_8, %c0_9], %13 {strides = array<i32>} : memref<672x1xf32, #tpu.memory_space<vmem>>, vector<672x1xf32>,
    } else {
    }
    %c0 = arith.constant 0 : index
    %c0_1 = arith.constant 0 : index
    %3 = vector.load %arg3[%c0, %c0_1] : memref<672x49xf32, #tpu.memory_space<vmem>>, vector<672x49xf32>
    %c0_2 = arith.constant 0 : index
    %c0_3 = arith.constant 0 : index
    %4 = vector.load %arg5[%c0_2, %c0_3] : memref<672x1xf32, #tpu.memory_space<vmem>>, vector<672x1xf32>
    %5 = vector.broadcast %4 : vector<672x1xf32> to vector<672x49xf32>
    %6 = arith.mulf %3, %5 : vector<672x49xf32>
    %c0_4 = arith.constant 0 : index
    %c0_5 = arith.constant 0 : index
    %7 = vector.load %arg4[%c0_4, %c0_5] : memref<672x49xf32, #tpu.memory_space<vmem>>, vector<672x49xf32>
    tpu.vector_store %arg4[%c0_4, %c0_5], %6 {strides = array<i32>} : memref<672x49xf32, #tpu.memory_space<vmem>>, vector<672x49xf32>,
    return
  }
  func.func @transform_0(%arg0: i32, %arg1: i32) -> (i32, i32) {
    %c0_i32 = arith.constant 0 : i32
    %c0_i32_0 = arith.constant 0 : i32
    return %arg0, %c0_i32 : i32, i32
  }
  func.func @transform_1(%arg0: i32, %arg1: i32) -> (i32, i32) {
    %c0_i32 = arith.constant 0 : i32
    return %arg0, %arg1 : i32, i32
  }
  func.func @transform_2(%arg0: i32, %arg1: i32) -> (i32, i32) {
    %c0_i32 = arith.constant 0 : i32
    return %arg0, %arg1 : i32, i32
  }
}

</mosaic_0001>

<bundles_post_ra>
// kernel: tpu_custom_call.1
= control target key start
LH: loop header
LB: loop body
LE: loop exit
PB: predicated region body
PF: predicated region fallthrough
CT: control target
= control target key end

     0   :  { %s2221_s9 = smov 0   ;;  %s2223_s10 = smov 0   ;;  %s2688_s0 = inlined_call_operand.vmem [shape: f32[1344,1], index: 0, kind: input, shape index: {}]   ;;  %s2689_s1 = inlined_call_operand.vmem [shape: f32[1344,49], index: 1, kind: input, shape index: {}]   ;;  %s2690_s2 = inlined_call_operand.vmem [shape: f32[1344,49], index: 2, kind: output, shape index: {}]  }
   0x1   :  { %s2225_s11 = smov 0  }
   0x2 LB: > { %s24_s12 = sadd.s32 1, %s2199_s10  ;;  %p1728_p0 = scmp.ge.s32.totalorder %s2203_s11, 1  ;;  %s2203_s11 = sphi %s2225_s11, %s12_s11   ;;  %s2199_s10 = sphi %s2223_s10, %s2692_s10   ;;  %s2195_s9 = sphi %s2221_s9, %s2691_s9  }
   0x3   : > { %p26_p1 = scmp.ge.s32.totalorder %s24_s12, 2  ;;  %p143_p2 = scmp.lt.s32.totalorder %s2203_s11, 3 }
   0x5   : > { %s2694_s12 = smov (%p26_p1, %s24_s12), 0  ;;  %p144_p3 = pnand %p1728_p0, %p143_p2 }
   0x6   : > { %s176_s13 = smul.u32 (!%p144_p3), 84, %s2195_s9  ;;  %v2205_v0 = vmov (!%p144_p3), 0   ;;  %vm792_vm0 = vcmask (!%p144_p3), 7168   ;;  %vm1549_vm1 = vcmask (!%p144_p3), 400384  }
   0x7   : > { %147 = sbr.rel (%p144_p3) target bundleno = 349 (0x15d), region = 28  ;;  %1844 = vset.pattern.permute.xlu1 (!%p144_p3), %v2205_v0  ;;  %1843 = vset.pattern.permute.xlu0 (!%p144_p3), %v2205_v0 }
   0x8   : > { %p177_p4 = scmp.lt.s32.totalorder (!%p144_p3), %s176_s13, 167 }
   0xe   : > { %s2696_s13 = smov (!%p177_p4, %s176_s13), 167 }
   0xf   : > { %s2239_s14 = sshll.u32 %s2696_s13, 3 }
  0x10   : > { %s2245_s17 = scalar_lea.vmem %s2688_s0, %s2239_s14  ;;  %s2399_s20 = scalar_lea.vmem %s2689_s1, %s2239_s14 }
  0x11   : > { %v206_v1 = vld [vmem:[%s2245_s17 + $0x10] sm:$0xff]  ;;  %v204_v2 = vld [vmem:[%s2245_s17] sm:$0xff]  ;;  %v207_v3 = vld [vmem:[%s2245_s17 + $0x18] sm:$0xff]  ;;  %s2413_s23 = scalar_lea.vmem %s2690_s2, %s2239_s14 }
  0x12   : > { %v1734_v4 = vmul.f32 -1.442695, %v206_v1  ;;  %v1732_v5 = vmul.f32 -1.442695, %v204_v2  ;;  %v1735_v6 = vmul.f32 -1.442695, %v207_v3 }
  0x13   : > { %v205_v7 = vld [vmem:[%s2245_s17 + $0x8] sm:$0xff]  ;;  %v208_v9 = vld [vmem:[%s2245_s17 + $0x20] sm:$0xff]  ;;  %v211_v13 = vld [vmem:[%s2245_s17 + $0x38] sm:$0xff] }
  0x14   : > { %v209_v8 = vld [vmem:[%s2245_s17 + $0x28] sm:$0xff]  ;;  %1845 = vpow2.f32 %v1734_v4  ;;  %v1733_v10 = vmul.f32 -1.442695, %v205_v7  ;;  %v1736_v12 = vmul.f32 -1.442695, %v208_v9  ;;  %v210_v14 = vld [vmem:[%s2245_s17 + $0x30] sm:$0xff] }
  0x15   : > { %v1737_v11 = vmul.f32 -1.442695, %v209_v8  ;;  %1847 = vpow2.f32 %v1732_v5  ;;  %v213_v15 = vld [vmem:[%s2245_s17 + $0x48] sm:$0xff]  ;;  %v1739_v16 = vmul.f32 -1.442695, %v211_v13  ;;  %v212_v18 = vld [vmem:[%s2245_s17 + $0x40] sm:$0xff] }
  0x16   : > { %1849 = vpow2.f32 %v1735_v6  ;;  %v1738_v17 = vmul.f32 -1.442695, %v210_v14  ;;  %v215_v19 = vld [vmem:[%s2245_s17 + $0x58] sm:$0xff]  ;;  %v1741_v20 = vmul.f32 -1.442695, %v213_v15  ;;  %v214_v21 = vld [vmem:[%s2245_s17 + $0x50] sm:$0xff] }
  0x17   : > { %1851 = vpow2.f32 %v1733_v10  ;;  %v1740_v22 = vmul.f32 -1.442695, %v212_v18  ;;  %v217_v23 = vld [vmem:[%s2245_s17 + $0x68] sm:$0xff]  ;;  %v1743_v24 = vmul.f32 -1.442695, %v215_v19  ;;  %v216_v46 = vld [vmem:[%s2245_s17 + $0x60] sm:$0xff] }
  0x18   : > { %1853 = vpow2.f32 %v1737_v11  ;;  %v1742_v25 = vmul.f32 -1.442695, %v214_v21  ;;  %v1745_v26 = vmul.f32 -1.442695, %v217_v23  ;;  %v219_v49 = vld [vmem:[%s2245_s17 + $0x78] sm:$0xff]  ;;  %v218_v52 = vld [vmem:[%s2245_s17 + $0x70] sm:$0xff] }
  0x19   : > { %1855 = vpow2.f32 %v1736_v12  ;;  %v1744_v55 = vmul.f32 -1.442695, %v216_v46  ;;  %v221_v56 = vld [vmem:[%s2245_s17 + $0x88] sm:$0xff]  ;;  %v1747_v59 = vmul.f32 -1.442695, %v219_v49  ;;  %v220_v60 = vld [vmem:[%s2245_s17 + $0x80] sm:$0xff] }
  0x1a   : > { %1857 = vpow2.f32 %v1739_v16  ;;  %v1746_v62 = vmul.f32 -1.442695, %v218_v52  ;;  %v223_v63 = vld [vmem:[%s2245_s17 + $0x98] sm:$0xff]  ;;  %v1749_v1 = vmul.f32 -1.442695, %v221_v56  ;;  %v222_v2 = vld [vmem:[%s2245_s17 + $0x90] sm:$0xff] }
  0x1b   : > { %1859 = vpow2.f32 %v1738_v17  ;;  %v1748_v4 = vmul.f32 -1.442695, %v220_v60  ;;  %v225_v5 = vld [vmem:[%s2245_s17 + $0xa8] sm:$0xff]  ;;  %v1751_v7 = vmul.f32 -1.442695, %v223_v63  ;;  %v224_v8 = vld [vmem:[%s2245_s17 + $0xa0] sm:$0xff] }
  0x1c   : > { %1861 = vpow2.f32 %v1741_v20  ;;  %v1750_v10 = vmul.f32 -1.442695, %v222_v2  ;;  %v227_v11 = vld [vmem:[%s2245_s17 + $0xb8] sm:$0xff]  ;;  %v1753_v13 = vmul.f32 -1.442695, %v225_v5  ;;  %v226_v14 = vld [vmem:[%s2245_s17 + $0xb0] sm:$0xff] }
  0x1d   : > { %1863 = vpow2.f32 %v1740_v22  ;;  %v1752_v16 = vmul.f32 -1.442695, %v224_v8  ;;  %v229_v17 = vld [vmem:[%s2245_s17 + $0xc8] sm:$0xff]  ;;  %v1755_v20 = vmul.f32 -1.442695, %v227_v11  ;;  %v228_v21 = vld [vmem:[%s2245_s17 + $0xc0] sm:$0xff] }
  0x1e   : > { %v1846_v27 = vpop.eup %1845  ;;  %1865 = vpow2.f32 %v1743_v24  ;;  %v1754_v24 = vmul.f32 -1.442695, %v226_v14  ;;  %v231_v56 = vld [vmem:[%s2245_s17 + $0xd8] sm:$0xff]  ;;  %v230_v60 = vld [vmem:[%s2245_s17 + $0xd0] sm:$0xff]  ;;  %v233_v63 = vld [vmem:[%s2245_s17 + $0xe8] sm:$0xff] }
  0x1f   : > { %v1848_v28 = vpop.eup %1847  ;;  %v542_v29 = vadd.f32 1.0, %v1846_v27  ;;  %1867 = vpow2.f32 %v1742_v25  ;;  %v1757_v27 = vmul.f32 -1.442695, %v229_v17  ;;  %v1759_v2 = vmul.f32 -1.442695, %v231_v56  ;;  %v235_v8 = vld [vmem:[%s2245_s17 + $0xf8] sm:$0xff] }
  0x20   : > { %v1850_v30 = vpop.eup %1849  ;;  %v540_v31 = vadd.f32 1.0, %v1848_v28  ;;  %1869 = vpow2.f32 %v1745_v26  ;;  %v1761_v11 = vmul.f32 -1.442695, %v233_v63  ;;  %v1763_v17 = vmul.f32 -1.442695, %v235_v8 }
  0x21   : > { %v1852_v32 = vpop.eup %1851  ;;  %1871 = vrcp.f32 %v542_v29  ;;  %v543_v33 = vadd.f32 1.0, %v1850_v30  ;;  %v1756_v30 = vmul.f32 -1.442695, %v228_v21 }
  0x22   : > { %v1854_v34 = vpop.eup %1853  ;;  %1873 = vrcp.f32 %v540_v31  ;;  %v541_v35 = vadd.f32 1.0, %v1852_v32 }
  0x23   : > { %v1856_v36 = vpop.eup %1855  ;;  %1875 = vrcp.f32 %v543_v33  ;;  %v545_v37 = vadd.f32 1.0, %v1854_v34 }
  0x24   : > { %v1858_v38 = vpop.eup %1857  ;;  %1877 = vrcp.f32 %v541_v35  ;;  %v544_v39 = vadd.f32 1.0, %v1856_v36 }
  0x25   : > { %v1860_v40 = vpop.eup %1859  ;;  %1879 = vrcp.f32 %v545_v37  ;;  %v547_v41 = vadd.f32 1.0, %v1858_v38 }
  0x26   : > { %v1862_v42 = vpop.eup %1861  ;;  %1881 = vrcp.f32 %v544_v39  ;;  %v546_v43 = vadd.f32 1.0, %v1860_v40 }
  0x27   : > { %v1864_v44 = vpop.eup %1863  ;;  %1883 = vrcp.f32 %v547_v41  ;;  %v549_v45 = vadd.f32 1.0, %v1862_v42 }
  0x28   : > { %v1866_v47 = vpop.eup %1865  ;;  %1885 = vrcp.f32 %v546_v43  ;;  %v548_v48 = vadd.f32 1.0, %v1864_v44 }
  0x29   : > { %v1868_v50 = vpop.eup %1867  ;;  %1887 = vrcp.f32 %v549_v45  ;;  %v551_v51 = vadd.f32 1.0, %v1866_v47 }
  0x2a   : > { %v1870_v53 = vpop.eup %1869  ;;  %1889 = vrcp.f32 %v548_v48  ;;  %v550_v54 = vadd.f32 1.0, %v1868_v50 }
  0x2b   : > { %v1872_v57 = vpop.eup %1871  ;;  %1891 = vrcp.f32 %v551_v51  ;;  %v553_v58 = vadd.f32 1.0, %v1870_v53 }
  0x2c   : > { %v1874_v61 = vpop.eup %1873  ;;  %795 = vst.msk [vmem:[#allocation2 + $0x10] sm:$0xff] %vm792_vm0, %v1872_v57  ;;  %1893 = vrcp.f32 %v550_v54 }
  0x2d   : > { %v1876_v0 = vpop.eup %1875  ;;  %793 = vst.msk [vmem:[#allocation2] sm:$0xff] %vm792_vm0, %v1874_v61  ;;  %1895 = vrcp.f32 %v553_v58 }
  0x2e   : > { %v1878_v3 = vpop.eup %1877  ;;  %796 = vst.msk [vmem:[#allocation2 + $0x18] sm:$0xff] %vm792_vm0, %v1876_v0  ;;  %1897 = vpow2.f32 %v1744_v55 }
  0x2f   : > { %v1880_v6 = vpop.eup %1879  ;;  %794 = vst.msk [vmem:[#allocation2 + $0x8] sm:$0xff] %vm792_vm0, %v1878_v3  ;;  %1899 = vpow2.f32 %v1747_v59  ;;  %v232_v3 = vld [vmem:[%s2245_s17 + $0xe0] sm:$0xff] }
  0x30   : > { %v1882_v9 = vpop.eup %1881  ;;  %798 = vst.msk [vmem:[#allocation2 + $0x28] sm:$0xff] %vm792_vm0, %v1880_v6  ;;  %1901 = vpow2.f32 %v1746_v62  ;;  %v1760_v14 = vmul.f32 -1.442695, %v232_v3 }
  0x31   : > { %v1884_v12 = vpop.eup %1883  ;;  %797 = vst.msk [vmem:[#allocation2 + $0x20] sm:$0xff] %vm792_vm0, %v1882_v9  ;;  %1903 = vpow2.f32 %v1749_v1 }
  0x32   : > { %v1886_v15 = vpop.eup %1885  ;;  %800 = vst.msk [vmem:[#allocation2 + $0x38] sm:$0xff] %vm792_vm0, %v1884_v12  ;;  %1905 = vpow2.f32 %v1748_v4  ;;  %v234_v12 = vld [vmem:[%s2245_s17 + $0xf0] sm:$0xff] }
  0x33   : > { %v1888_v18 = vpop.eup %1887  ;;  %v963_v19 = vld [vmem:[#allocation2 + $0x10] sm:$0xff]  ;;  %799 = vst.msk [vmem:[#allocation2 + $0x30] sm:$0xff] %vm792_vm0, %v1886_v15  ;;  %1907 = vpow2.f32 %v1751_v7  ;;  %v1758_v7 = vmul.f32 -1.442695, %v230_v60  ;;  %v237_v15 = vld [vmem:[%s2245_s17 + $0x108] sm:$0xff] }
  0x34   : > { %v1890_v22 = vpop.eup %1889  ;;  %1057 = vperm.xlu1 %1844, %v963_v19   ;;  %v961_v23 = vld [vmem:[#allocation2] sm:$0xff]  ;;  %802 = vst.msk [vmem:[#allocation2 + $0x48] sm:$0xff] %vm792_vm0, %v1888_v18  ;;  %1909 = vpow2.f32 %v1750_v10  ;;  %v1762_v21 = vmul.f32 -1.442695, %v234_v12 }
  0x35   : > { %v1892_v25 = vpop.eup %1891  ;;  %1047 = vperm.xlu0 %1843, %v961_v23   ;;  %v964_v26 = vld [vmem:[#allocation2 + $0x18] sm:$0xff]  ;;  %801 = vst.msk [vmem:[#allocation2 + $0x40] sm:$0xff] %vm792_vm0, %v1890_v22  ;;  %1911 = vpow2.f32 %v1753_v13  ;;  %v236_v18 = vld [vmem:[%s2245_s17 + $0x100] sm:$0xff] }
  0x36   : > { %v1894_v28 = vpop.eup %1893  ;;  %v962_v29 = vld [vmem:[#allocation2 + $0x8] sm:$0xff]  ;;  %804 = vst.msk [vmem:[#allocation2 + $0x58] sm:$0xff] %vm792_vm0, %v1892_v25  ;;  %1913 = vpow2.f32 %v1752_v16  ;;  %v239_v22 = vld [vmem:[%s2245_s17 + $0x118] sm:$0xff]  ;;  %v238_v25 = vld [vmem:[%s2245_s17 + $0x110] sm:$0xff] }
  0x37   : > { %v1896_v31 = vpop.eup %1895  ;;  %803 = vst.msk [vmem:[#allocation2 + $0x50] sm:$0xff] %vm792_vm0, %v1894_v28  ;;  %1915 = vpow2.f32 %v1755_v20  ;;  %v966_v34 = vld [vmem:[#allocation2 + $0x28] sm:$0xff] }
  0x38   : > { %v1898_v32 = vpop.eup %1897  ;;  %1062 = vperm.xlu1 %1844, %v964_v26   ;;  %806 = vst.msk [vmem:[#allocation2 + $0x68] sm:$0xff] %vm792_vm0, %v1896_v31  ;;  %1917 = vpow2.f32 %v1754_v24  ;;  %v965_v37 = vld [vmem:[#allocation2 + $0x20] sm:$0xff]  ;;  %v1765_v24 = vmul.f32 -1.442695, %v237_v15  ;;  %v241_v28 = vld [vmem:[%s2245_s17 + $0x128] sm:$0xff] }
  0x39   : > { %v1900_v33 = vpop.eup %1899  ;;  %1052 = vperm.xlu0 %1843, %v962_v29   ;;  %v552_v35 = vadd.f32 1.0, %v1898_v32  ;;  %1919 = vpow2.f32 %v1757_v27  ;;  %v968_v44 = vld [vmem:[#allocation2 + $0x38] sm:$0xff]  ;;  %v1764_v27 = vmul.f32 -1.442695, %v236_v18  ;;  %v240_v31 = vld [vmem:[%s2245_s17 + $0x120] sm:$0xff] }
  0x3a   : > { %v1902_v36 = vpop.eup %1901  ;;  %v555_v38 = vadd.f32 1.0, %v1900_v33  ;;  %1921 = vpow2.f32 %v1756_v30  ;;  %v967_v47 = vld [vmem:[#allocation2 + $0x30] sm:$0xff]  ;;  %v1767_v30 = vmul.f32 -1.442695, %v239_v22 }
  0x3b   : > { %v1904_v39 = vpop.eup %1903  ;;  %1923 = vrcp.f32 %v552_v35  ;;  %v554_v40 = vadd.f32 1.0, %v1902_v36  ;;  %v970_v54 = vld [vmem:[#allocation2 + $0x48] sm:$0xff]  ;;  %v243_v35 = vld [vmem:[%s2245_s17 + $0x138] sm:$0xff]  ;;  %v246_v22 = vld [vmem:[%s2245_s17 + $0x150] sm:$0xff] }
  0x3c   : > { %v1906_v41 = vpop.eup %1905  ;;  %1072 = vperm.xlu1 %1844, %v966_v34   ;;  %1925 = vrcp.f32 %v555_v38  ;;  %v557_v42 = vadd.f32 1.0, %v1904_v39  ;;  %v969_v58 = vld [vmem:[#allocation2 + $0x40] sm:$0xff]  ;;  %v1766_v34 = vmul.f32 -1.442695, %v238_v25  ;;  %v1769_v38 = vmul.f32 -1.442695, %v241_v28 }
  0x3d   : > { %v1908_v43 = vpop.eup %1907  ;;  %1067 = vperm.xlu0 %1843, %v965_v37   ;;  %1927 = vrcp.f32 %v554_v40  ;;  %v556_v45 = vadd.f32 1.0, %v1906_v41  ;;  %v972_v5 = vld [vmem:[#allocation2 + $0x58] sm:$0xff]  ;;  %v1768_v41 = vmul.f32 -1.442695, %v240_v31  ;;  %v249_v25 = vld [vmem:[%s2245_s17 + $0x168] sm:$0xff] }
  0x3e   : > { %v1910_v46 = vpop.eup %1909  ;;  %1929 = vrcp.f32 %v557_v42  ;;  %v559_v48 = vadd.f32 1.0, %v1908_v43  ;;  %v971_v10 = vld [vmem:[#allocation2 + $0x50] sm:$0xff]  ;;  %v1771_v43 = vmul.f32 -1.442695, %v243_v35  ;;  %v1774_v31 = vmul.f32 -1.442695, %v246_v22 }
  0x3f   : > { %v1912_v49 = vpop.eup %1911  ;;  %1931 = vrcp.f32 %v556_v45  ;;  %v558_v50 = vadd.f32 1.0, %v1910_v46  ;;  %v974_v20 = vld [vmem:[#allocation2 + $0x68] sm:$0xff]  ;;  %v1777_v35 = vmul.f32 -1.442695, %v249_v25 }
  0x40   : > { %v1914_v51 = vpop.eup %1913  ;;  %1082 = vperm.xlu1 %1844, %v968_v44   ;;  %1933 = vrcp.f32 %v559_v48  ;;  %v561_v52 = vadd.f32 1.0, %v1912_v49 }
  0x41   : > { %v1916_v53 = vpop.eup %1915  ;;  %1077 = vperm.xlu0 %1843, %v967_v47   ;;  %1935 = vrcp.f32 %v558_v50  ;;  %v560_v55 = vadd.f32 1.0, %v1914_v51 }
  0x42   : > { %v1918_v57 = vpop.eup %1917  ;;  %1937 = vrcp.f32 %v561_v52  ;;  %v563_v59 = vadd.f32 1.0, %v1916_v53 }
  0x43   : > { %v1920_v61 = vpop.eup %1919  ;;  %1939 = vrcp.f32 %v560_v55  ;;  %v562_v62 = vadd.f32 1.0, %v1918_v57 }
  0x44   : > { %v1922_v0 = vpop.eup %1921  ;;  %1092 = vperm.xlu1 %1844, %v970_v54   ;;  %1941 = vrcp.f32 %v563_v59  ;;  %v565_v1 = vadd.f32 1.0, %v1920_v61 }
  0x45   : > { %v1924_v4 = vpop.eup %1923  ;;  %1087 = vperm.xlu0 %1843, %v969_v58   ;;  %1943 = vrcp.f32 %v562_v62  ;;  %v564_v6 = vadd.f32 1.0, %v1922_v0 }
  0x46   : > { %v1926_v9 = vpop.eup %1925  ;;  %805 = vst.msk [vmem:[#allocation2 + $0x60] sm:$0xff] %vm792_vm0, %v1924_v4  ;;  %1945 = vrcp.f32 %v565_v1 }
  0x47   : > { %v1928_v13 = vpop.eup %1927  ;;  %808 = vst.msk [vmem:[#allocation2 + $0x78] sm:$0xff] %vm792_vm0, %v1926_v9  ;;  %1947 = vrcp.f32 %v564_v6  ;;  %v242_v6 = vld [vmem:[%s2245_s17 + $0x130] sm:$0xff]  ;;  %v245_v9 = vld [vmem:[%s2245_s17 + $0x148] sm:$0xff] }
  0x48   : > { %v1930_v16 = vpop.eup %1929  ;;  %1102 = vperm.xlu1 %1844, %v972_v5   ;;  %807 = vst.msk [vmem:[#allocation2 + $0x70] sm:$0xff] %vm792_vm0, %v1928_v13  ;;  %1949 = vpow2.f32 %v1759_v2  ;;  %v244_v13 = vld [vmem:[%s2245_s17 + $0x140] sm:$0xff] }
  0x49   : > { %v1932_v19 = vpop.eup %1931  ;;  %1097 = vperm.xlu0 %1843, %v971_v10   ;;  %810 = vst.msk [vmem:[#allocation2 + $0x88] sm:$0xff] %vm792_vm0, %v1930_v16  ;;  %1951 = vpow2.f32 %v1758_v7  ;;  %v1770_v16 = vmul.f32 -1.442695, %v242_v6 }
  0x4a   : > { %v1934_v23 = vpop.eup %1933  ;;  %809 = vst.msk [vmem:[#allocation2 + $0x80] sm:$0xff] %vm792_vm0, %v1932_v19  ;;  %1953 = vpow2.f32 %v1761_v11 }
  0x4b   : > { %v1936_v26 = vpop.eup %1935  ;;  %812 = vst.msk [vmem:[#allocation2 + $0x98] sm:$0xff] %vm792_vm0, %v1934_v23  ;;  %1955 = vpow2.f32 %v1760_v14 }
  0x4c   : > { %v1938_v29 = vpop.eup %1937  ;;  %1112 = vperm.xlu1 %1844, %v974_v20   ;;  %811 = vst.msk [vmem:[#allocation2 + $0x90] sm:$0xff] %vm792_vm0, %v1936_v26  ;;  %1957 = vpow2.f32 %v1763_v17  ;;  %v247_v17 = vld [vmem:[%s2245_s17 + $0x158] sm:$0xff] }
  0x4d   : > { %v1940_v32 = vpop.eup %1939  ;;  %v973_v33 = vld [vmem:[#allocation2 + $0x60] sm:$0xff]  ;;  %814 = vst.msk [vmem:[#allocation2 + $0xa8] sm:$0xff] %vm792_vm0, %v1938_v29  ;;  %1959 = vpow2.f32 %v1762_v21  ;;  %v1773_v21 = vmul.f32 -1.442695, %v245_v9  ;;  %v1775_v28 = vmul.f32 -1.442695, %v247_v17 }
  0x4e   : > { %v1942_v36 = vpop.eup %1941  ;;  %1107 = vperm.xlu0 %1843, %v973_v33   ;;  %v976_v37 = vld [vmem:[#allocation2 + $0x78] sm:$0xff]  ;;  %813 = vst.msk [vmem:[#allocation2 + $0xa0] sm:$0xff] %vm792_vm0, %v1940_v32  ;;  %1961 = vpow2.f32 %v1765_v24  ;;  %v1772_v24 = vmul.f32 -1.442695, %v244_v13  ;;  %v248_v29 = vld [vmem:[%s2245_s17 + $0x160] sm:$0xff] }
  0x4f   : > { %v1944_v39 = vpop.eup %1943  ;;  %v975_v40 = vld [vmem:[#allocation2 + $0x70] sm:$0xff]  ;;  %816 = vst.msk [vmem:[#allocation2 + $0xb8] sm:$0xff] %vm792_vm0, %v1942_v36  ;;  %1963 = vpow2.f32 %v1764_v27  ;;  %v251_v32 = vld [vmem:[%s2245_s17 + $0x178] sm:$0xff] }
  0x50   : > { %v1946_v42 = vpop.eup %1945  ;;  %1122 = vperm.xlu1 %1844, %v976_v37   ;;  %815 = vst.msk [vmem:[#allocation2 + $0xb0] sm:$0xff] %vm792_vm0, %v1944_v39  ;;  %1965 = vpow2.f32 %v1767_v30  ;;  %v978_v45 = vld [vmem:[#allocation2 + $0x88] sm:$0xff]  ;;  %v250_v36 = vld [vmem:[%s2245_s17 + $0x170] sm:$0xff] }
  0x51   : > { %v1948_v44 = vpop.eup %1947  ;;  %818 = vst.msk [vmem:[#allocation2 + $0xc8] sm:$0xff] %vm792_vm0, %v1946_v42  ;;  %1967 = vpow2.f32 %v1766_v34  ;;  %v977_v48 = vld [vmem:[#allocation2 + $0x80] sm:$0xff]  ;;  %v253_v39 = vld [vmem:[%s2245_s17 + $0x188] sm:$0xff] }
  0x52   : > { %v1950_v46 = vpop.eup %1949  ;;  %1117 = vperm.xlu0 %1843, %v975_v40   ;;  %817 = vst.msk [vmem:[#allocation2 + $0xc0] sm:$0xff] %vm792_vm0, %v1948_v44  ;;  %1969 = vpow2.f32 %v1769_v38  ;;  %v980_v53 = vld [vmem:[#allocation2 + $0x98] sm:$0xff]  ;;  %v1776_v38 = vmul.f32 -1.442695, %v248_v29  ;;  %v252_v42 = vld [vmem:[%s2245_s17 + $0x180] sm:$0xff] }
  0x53   : > { %v1952_v47 = vpop.eup %1951  ;;  %v567_v49 = vadd.f32 1.0, %v1950_v46  ;;  %1971 = vpow2.f32 %v1768_v41  ;;  %v979_v58 = vld [vmem:[#allocation2 + $0x90] sm:$0xff]  ;;  %v1779_v41 = vmul.f32 -1.442695, %v251_v32  ;;  %v1778_v44 = vmul.f32 -1.442695, %v250_v36 }
  0x54   : > { %v1954_v50 = vpop.eup %1953  ;;  %1132 = vperm.xlu1 %1844, %v978_v45   ;;  %v566_v51 = vadd.f32 1.0, %v1952_v47  ;;  %1973 = vpow2.f32 %v1771_v43  ;;  %v982_v63 = vld [vmem:[#allocation2 + $0xa8] sm:$0xff]  ;;  %v255_v45 = vld [vmem:[%s2245_s17 + $0x198] sm:$0xff] }
  0x55   : > { %v1956_v52 = vpop.eup %1955  ;;  %1975 = vrcp.f32 %v567_v49  ;;  %v569_v54 = vadd.f32 1.0, %v1954_v50  ;;  %v981_v4 = vld [vmem:[#allocation2 + $0xa0] sm:$0xff]  ;;  %v254_v49 = vld [vmem:[%s2245_s17 + $0x190] sm:$0xff]  ;;  %v261_v36 = vld [vmem:[%s2245_s17 + $0x1c8] sm:$0xff] }
  0x56   : > { %v1958_v55 = vpop.eup %1957  ;;  %1127 = vperm.xlu0 %1843, %v977_v48   ;;  %1977 = vrcp.f32 %v566_v51  ;;  %v568_v56 = vadd.f32 1.0, %v1956_v52  ;;  %v984_v11 = vld [vmem:[#allocation2 + $0xb8] sm:$0xff]  ;;  %v1781_v48 = vmul.f32 -1.442695, %v253_v39  ;;  %v1780_v52 = vmul.f32 -1.442695, %v252_v42 }
  0x57   : > { %v1960_v57 = vpop.eup %1959  ;;  %1979 = vrcp.f32 %v569_v54  ;;  %v571_v59 = vadd.f32 1.0, %v1958_v55  ;;  %v983_v19 = vld [vmem:[#allocation2 + $0xb0] sm:$0xff]  ;;  %v1783_v55 = vmul.f32 -1.442695, %v255_v45  ;;  %v260_v39 = vld [vmem:[%s2245_s17 + $0x1c0] sm:$0xff] }
  0x58   : > { %v1962_v60 = vpop.eup %1961  ;;  %1142 = vperm.xlu1 %1844, %v980_v53   ;;  %1981 = vrcp.f32 %v568_v56  ;;  %v570_v61 = vadd.f32 1.0, %v1960_v57  ;;  %v986_v27 = vld [vmem:[#allocation2 + $0xc8] sm:$0xff]  ;;  %v1782_v57 = vmul.f32 -1.442695, %v254_v49  ;;  %v1789_v45 = vmul.f32 -1.442695, %v261_v36 }
  0x59   : > { %v1964_v62 = vpop.eup %1963  ;;  %1983 = vrcp.f32 %v571_v59  ;;  %v573_v0 = vadd.f32 1.0, %v1962_v60  ;;  %v985_v34 = vld [vmem:[#allocation2 + $0xc0] sm:$0xff]  ;;  %v1788_v49 = vmul.f32 -1.442695, %v260_v39 }
  0x5a   : > { %v1966_v1 = vpop.eup %1965  ;;  %1137 = vperm.xlu0 %1843, %v979_v58   ;;  %1985 = vrcp.f32 %v570_v61  ;;  %v572_v2 = vadd.f32 1.0, %v1964_v62 }
  0x5b   : > { %v1968_v3 = vpop.eup %1967  ;;  %1987 = vrcp.f32 %v573_v0  ;;  %v575_v5 = vadd.f32 1.0, %v1966_v1 }
  0x5c   : > { %v1970_v7 = vpop.eup %1969  ;;  %1152 = vperm.xlu1 %1844, %v982_v63   ;;  %1989 = vrcp.f32 %v572_v2  ;;  %v574_v8 = vadd.f32 1.0, %v1968_v3 }
  0x5d   : > { %v1972_v10 = vpop.eup %1971  ;;  %1991 = vrcp.f32 %v575_v5  ;;  %v577_v12 = vadd.f32 1.0, %v1970_v7 }
  0x5e   : > { %v1974_v14 = vpop.eup %1973  ;;  %1147 = vperm.xlu0 %1843, %v981_v4   ;;  %1993 = vrcp.f32 %v574_v8  ;;  %v576_v15 = vadd.f32 1.0, %v1972_v10 }
  0x5f   : > { %v1976_v18 = vpop.eup %1975  ;;  %1995 = vrcp.f32 %v577_v12  ;;  %v579_v20 = vadd.f32 1.0, %v1974_v14 }
  0x60   : > { %v1978_v23 = vpop.eup %1977  ;;  %1162 = vperm.xlu1 %1844, %v984_v11   ;;  %820 = vst.msk [vmem:[#allocation2 + $0xd8] sm:$0xff] %vm792_vm0, %v1976_v18  ;;  %1997 = vrcp.f32 %v576_v15 }
  0x61   : > { %v1980_v26 = vpop.eup %1979  ;;  %819 = vst.msk [vmem:[#allocation2 + $0xd0] sm:$0xff] %vm792_vm0, %v1978_v23  ;;  %1999 = vrcp.f32 %v579_v20  ;;  %v257_v20 = vld [vmem:[%s2245_s17 + $0x1a8] sm:$0xff]  ;;  %v256_v23 = vld [vmem:[%s2245_s17 + $0x1a0] sm:$0xff] }
  0x62   : > { %v1982_v30 = vpop.eup %1981  ;;  %1157 = vperm.xlu0 %1843, %v983_v19   ;;  %822 = vst.msk [vmem:[#allocation2 + $0xe8] sm:$0xff] %vm792_vm0, %v1980_v26  ;;  %2001 = vpow2.f32 %v1770_v16 }
  0x63   : > { %v1984_v33 = vpop.eup %1983  ;;  %821 = vst.msk [vmem:[#allocation2 + $0xe0] sm:$0xff] %vm792_vm0, %v1982_v30  ;;  %2003 = vpow2.f32 %v1773_v21  ;;  %v1785_v30 = vmul.f32 -1.442695, %v257_v20 }
  0x64   : > { %v1986_v37 = vpop.eup %1985  ;;  %1172 = vperm.xlu1 %1844, %v986_v27   ;;  %824 = vst.msk [vmem:[#allocation2 + $0xf8] sm:$0xff] %vm792_vm0, %v1984_v33  ;;  %2005 = vpow2.f32 %v1772_v24  ;;  %v259_v27 = vld [vmem:[%s2245_s17 + $0x1b8] sm:$0xff] }
  0x65   : > { %v1988_v40 = vpop.eup %1987  ;;  %823 = vst.msk [vmem:[#allocation2 + $0xf0] sm:$0xff] %vm792_vm0, %v1986_v37  ;;  %2007 = vpow2.f32 %v1775_v28 }
  0x66   : > { %v1990_v43 = vpop.eup %1989  ;;  %1167 = vperm.xlu0 %1843, %v985_v34   ;;  %826 = vst.msk [vmem:[#allocation2 + $0x108] sm:$0xff] %vm792_vm0, %v1988_v40  ;;  %2009 = vpow2.f32 %v1774_v31  ;;  %v258_v31 = vld [vmem:[%s2245_s17 + $0x1b0] sm:$0xff] }
  0x67   : > { %v1992_v46 = vpop.eup %1991  ;;  %v988_v47 = vld [vmem:[#allocation2 + $0xd8] sm:$0xff]  ;;  %825 = vst.msk [vmem:[#allocation2 + $0x100] sm:$0xff] %vm792_vm0, %v1990_v43  ;;  %2011 = vpow2.f32 %v1777_v35  ;;  %v1784_v35 = vmul.f32 -1.442695, %v256_v23  ;;  %v1786_v42 = vmul.f32 -1.442695, %v258_v31 }
  0x68   : > { %v1994_v50 = vpop.eup %1993  ;;  %1182 = vperm.xlu1 %1844, %v988_v47   ;;  %v987_v51 = vld [vmem:[#allocation2 + $0xd0] sm:$0xff]  ;;  %828 = vst.msk [vmem:[#allocation2 + $0x118] sm:$0xff] %vm792_vm0, %v1992_v46  ;;  %2013 = vpow2.f32 %v1776_v38  ;;  %v1787_v38 = vmul.f32 -1.442695, %v259_v27  ;;  %v263_v43 = vld [vmem:[%s2245_s17 + $0x1d8] sm:$0xff] }
  0x69   : > { %v1996_v53 = vpop.eup %1995  ;;  %v990_v54 = vld [vmem:[#allocation2 + $0xe8] sm:$0xff]  ;;  %827 = vst.msk [vmem:[#allocation2 + $0x110] sm:$0xff] %vm792_vm0, %v1994_v50  ;;  %2015 = vpow2.f32 %v1779_v41  ;;  %v262_v46 = vld [vmem:[%s2245_s17 + $0x1d0] sm:$0xff] }
  0x6a   : > { %v1998_v56 = vpop.eup %1997  ;;  %1177 = vperm.xlu0 %1843, %v987_v51   ;;  %830 = vst.msk [vmem:[#allocation2 + $0x128] sm:$0xff] %vm792_vm0, %v1996_v53  ;;  %2017 = vpow2.f32 %v1778_v44  ;;  %v989_v59 = vld [vmem:[#allocation2 + $0xe0] sm:$0xff]  ;;  %v265_v50 = vld [vmem:[%s2245_s17 + $0x1e8] sm:$0xff] }
  0x6b   : > { %v2000_v58 = vpop.eup %1999  ;;  %829 = vst.msk [vmem:[#allocation2 + $0x120] sm:$0xff] %vm792_vm0, %v1998_v56  ;;  %2019 = vpow2.f32 %v1781_v48  ;;  %v992_v62 = vld [vmem:[#allocation2 + $0xf8] sm:$0xff]  ;;  %v264_v53 = vld [vmem:[%s2245_s17 + $0x1e0] sm:$0xff] }
  0x6c   : > { %v2002_v60 = vpop.eup %2001  ;;  %1192 = vperm.xlu1 %1844, %v990_v54   ;;  %832 = vst.msk [vmem:[#allocation2 + $0x138] sm:$0xff] %vm792_vm0, %v2000_v58  ;;  %2021 = vpow2.f32 %v1780_v52  ;;  %v991_v3 = vld [vmem:[#allocation2 + $0xf0] sm:$0xff]  ;;  %v1791_v52 = vmul.f32 -1.442695, %v263_v43  ;;  %v267_v56 = vld [vmem:[%s2245_s17 + $0x1f8] sm:$0xff] }
  0x6d   : > { %v2004_v61 = vpop.eup %2003  ;;  %v578_v63 = vadd.f32 1.0, %v2002_v60  ;;  %2023 = vpow2.f32 %v1783_v55  ;;  %v994_v8 = vld [vmem:[#allocation2 + $0x108] sm:$0xff]  ;;  %v1790_v55 = vmul.f32 -1.442695, %v262_v46  ;;  %v1793_v58 = vmul.f32 -1.442695, %v265_v50 }
  0x6e   : > { %v2006_v0 = vpop.eup %2005  ;;  %1187 = vperm.xlu0 %1843, %v989_v59   ;;  %v581_v1 = vadd.f32 1.0, %v2004_v61  ;;  %2025 = vpow2.f32 %v1782_v57  ;;  %v993_v13 = vld [vmem:[#allocation2 + $0x100] sm:$0xff]  ;;  %v266_v59 = vld [vmem:[%s2245_s17 + $0x1f0] sm:$0xff] }
  0x6f   : > { %v2008_v2 = vpop.eup %2007  ;;  %2027 = vrcp.f32 %v578_v63  ;;  %v580_v4 = vadd.f32 1.0, %v2006_v0  ;;  %v996_v18 = vld [vmem:[#allocation2 + $0x118] sm:$0xff]  ;;  %v269_v63 = vld [vmem:[%s2245_s17 + $0x208] sm:$0xff]  ;;  %v272_v50 = vld [vmem:[%s2245_s17 + $0x220] sm:$0xff] }
  0x70   : > { %v2010_v5 = vpop.eup %2009  ;;  %1202 = vperm.xlu1 %1844, %v992_v62   ;;  %2029 = vrcp.f32 %v581_v1  ;;  %v583_v6 = vadd.f32 1.0, %v2008_v2  ;;  %v995_v25 = vld [vmem:[#allocation2 + $0x110] sm:$0xff]  ;;  %v1792_v62 = vmul.f32 -1.442695, %v264_v53  ;;  %v1795_v2 = vmul.f32 -1.442695, %v267_v56 }
  0x71   : > { %v2012_v7 = vpop.eup %2011  ;;  %2031 = vrcp.f32 %v580_v4  ;;  %v582_v9 = vadd.f32 1.0, %v2010_v5  ;;  %v998_v33 = vld [vmem:[#allocation2 + $0x128] sm:$0xff]  ;;  %v1794_v5 = vmul.f32 -1.442695, %v266_v59  ;;  %v275_v53 = vld [vmem:[%s2245_s17 + $0x238] sm:$0xff] }
  0x72   : > { %v2014_v10 = vpop.eup %2013  ;;  %1197 = vperm.xlu0 %1843, %v991_v3   ;;  %2033 = vrcp.f32 %v583_v6  ;;  %v585_v11 = vadd.f32 1.0, %v2012_v7  ;;  %v997_v41 = vld [vmem:[#allocation2 + $0x120] sm:$0xff]  ;;  %v1797_v7 = vmul.f32 -1.442695, %v269_v63  ;;  %v1800_v59 = vmul.f32 -1.442695, %v272_v50 }
  0x73   : > { %v2016_v12 = vpop.eup %2015  ;;  %2035 = vrcp.f32 %v582_v9  ;;  %v584_v14 = vadd.f32 1.0, %v2014_v10  ;;  %v1000_v48 = vld [vmem:[#allocation2 + $0x138] sm:$0xff]  ;;  %v1803_v63 = vmul.f32 -1.442695, %v275_v53 }
  0x74   : > { %v2018_v15 = vpop.eup %2017  ;;  %1212 = vperm.xlu1 %1844, %v994_v8   ;;  %2037 = vrcp.f32 %v585_v11  ;;  %v587_v16 = vadd.f32 1.0, %v2016_v12 }
  0x75   : > { %v2020_v17 = vpop.eup %2019  ;;  %2039 = vrcp.f32 %v584_v14  ;;  %v586_v19 = vadd.f32 1.0, %v2018_v15 }
  0x76   : > { %v2022_v21 = vpop.eup %2021  ;;  %1207 = vperm.xlu0 %1843, %v993_v13   ;;  %2041 = vrcp.f32 %v587_v16  ;;  %v589_v22 = vadd.f32 1.0, %v2020_v17 }
  0x77   : > { %v2024_v24 = vpop.eup %2023  ;;  %2043 = vrcp.f32 %v586_v19  ;;  %v588_v26 = vadd.f32 1.0, %v2022_v21 }
  0x78   : > { %v2026_v28 = vpop.eup %2025  ;;  %1222 = vperm.xlu1 %1844, %v996_v18   ;;  %2045 = vrcp.f32 %v589_v22  ;;  %v591_v29 = vadd.f32 1.0, %v2024_v24 }
  0x79   : > { %v2028_v32 = vpop.eup %2027  ;;  %2047 = vrcp.f32 %v588_v26  ;;  %v590_v34 = vadd.f32 1.0, %v2026_v28 }
  0x7a   : > { %v2030_v37 = vpop.eup %2029  ;;  %1217 = vperm.xlu0 %1843, %v995_v25   ;;  %831 = vst.msk [vmem:[#allocation2 + $0x130] sm:$0xff] %vm792_vm0, %v2028_v32  ;;  %2049 = vrcp.f32 %v591_v29 }
  0x7b   : > { %v2032_v40 = vpop.eup %2031  ;;  %834 = vst.msk [vmem:[#allocation2 + $0x148] sm:$0xff] %vm792_vm0, %v2030_v37  ;;  %2051 = vrcp.f32 %v590_v34  ;;  %v268_v34 = vld [vmem:[%s2245_s17 + $0x200] sm:$0xff]  ;;  %v271_v37 = vld [vmem:[%s2245_s17 + $0x218] sm:$0xff] }
  0x7c   : > { %v2034_v44 = vpop.eup %2033  ;;  %1232 = vperm.xlu1 %1844, %v998_v33   ;;  %833 = vst.msk [vmem:[#allocation2 + $0x140] sm:$0xff] %vm792_vm0, %v2032_v40  ;;  %2053 = vpow2.f32 %v1785_v30 }
  0x7d   : > { %v2036_v47 = vpop.eup %2035  ;;  %836 = vst.msk [vmem:[#allocation2 + $0x158] sm:$0xff] %vm792_vm0, %v2034_v44  ;;  %2055 = vpow2.f32 %v1784_v35  ;;  %v1796_v44 = vmul.f32 -1.442695, %v268_v34 }
  0x7e   : > { %v2038_v51 = vpop.eup %2037  ;;  %1227 = vperm.xlu0 %1843, %v997_v41   ;;  %835 = vst.msk [vmem:[#allocation2 + $0x150] sm:$0xff] %vm792_vm0, %v2036_v47  ;;  %2057 = vpow2.f32 %v1787_v38  ;;  %v270_v41 = vld [vmem:[%s2245_s17 + $0x210] sm:$0xff] }
  0x7f   : > { %v2040_v54 = vpop.eup %2039  ;;  %838 = vst.msk [vmem:[#allocation2 + $0x168] sm:$0xff] %vm792_vm0, %v2038_v51  ;;  %2059 = vpow2.f32 %v1786_v42 }
  0x80   : > { %v2042_v57 = vpop.eup %2041  ;;  %1242 = vperm.xlu1 %1844, %v1000_v48   ;;  %837 = vst.msk [vmem:[#allocation2 + $0x160] sm:$0xff] %vm792_vm0, %v2040_v54  ;;  %2061 = vpow2.f32 %v1789_v45  ;;  %v273_v45 = vld [vmem:[%s2245_s17 + $0x228] sm:$0xff] }
  0x81   : > { %v2044_v60 = vpop.eup %2043  ;;  %v999_v61 = vld [vmem:[#allocation2 + $0x130] sm:$0xff]  ;;  %840 = vst.msk [vmem:[#allocation2 + $0x178] sm:$0xff] %vm792_vm0, %v2042_v57  ;;  %2063 = vpow2.f32 %v1788_v49  ;;  %v1799_v49 = vmul.f32 -1.442695, %v271_v37  ;;  %v1801_v56 = vmul.f32 -1.442695, %v273_v45 }
  0x82   : > { %v2046_v0 = vpop.eup %2045  ;;  %1237 = vperm.xlu0 %1843, %v999_v61   ;;  %v1002_v1 = vld [vmem:[#allocation2 + $0x148] sm:$0xff]  ;;  %839 = vst.msk [vmem:[#allocation2 + $0x170] sm:$0xff] %vm792_vm0, %v2044_v60  ;;  %2065 = vpow2.f32 %v1791_v52  ;;  %v1798_v52 = vmul.f32 -1.442695, %v270_v41  ;;  %v274_v57 = vld [vmem:[%s2245_s17 + $0x230] sm:$0xff] }
  0x83   : > { %v2048_v3 = vpop.eup %2047  ;;  %v1001_v4 = vld [vmem:[#allocation2 + $0x140] sm:$0xff]  ;;  %842 = vst.msk [vmem:[#allocation2 + $0x188] sm:$0xff] %vm792_vm0, %v2046_v0  ;;  %2067 = vpow2.f32 %v1790_v55  ;;  %v277_v60 = vld [vmem:[%s2245_s17 + $0x248] sm:$0xff] }
  0x84   : > { %v2050_v6 = vpop.eup %2049  ;;  %1252 = vperm.xlu1 %1844, %v1002_v1   ;;  %841 = vst.msk [vmem:[#allocation2 + $0x180] sm:$0xff] %vm792_vm0, %v2048_v3  ;;  %2069 = vpow2.f32 %v1793_v58  ;;  %v1004_v9 = vld [vmem:[#allocation2 + $0x158] sm:$0xff]  ;;  %v276_v0 = vld [vmem:[%s2245_s17 + $0x240] sm:$0xff] }
  0x85   : > { %v2052_v8 = vpop.eup %2051  ;;  %844 = vst.msk [vmem:[#allocation2 + $0x198] sm:$0xff] %vm792_vm0, %v2050_v6  ;;  %2071 = vpow2.f32 %v1792_v62  ;;  %v1003_v12 = vld [vmem:[#allocation2 + $0x150] sm:$0xff]  ;;  %v279_v3 = vld [vmem:[%s2245_s17 + $0x258] sm:$0xff] }
  0x86   : > { %v2054_v10 = vpop.eup %2053  ;;  %1247 = vperm.xlu0 %1843, %v1001_v4   ;;  %843 = vst.msk [vmem:[#allocation2 + $0x190] sm:$0xff] %vm792_vm0, %v2052_v8  ;;  %2073 = vpow2.f32 %v1795_v2  ;;  %v1006_v17 = vld [vmem:[#allocation2 + $0x168] sm:$0xff]  ;;  %v1802_v2 = vmul.f32 -1.442695, %v274_v57  ;;  %v278_v6 = vld [vmem:[%s2245_s17 + $0x250] sm:$0xff] }
  0x87   : > { %v2056_v11 = vpop.eup %2055  ;;  %v593_v13 = vadd.f32 1.0, %v2054_v10  ;;  %2075 = vpow2.f32 %v1794_v5  ;;  %v1005_v22 = vld [vmem:[#allocation2 + $0x160] sm:$0xff]  ;;  %v1805_v5 = vmul.f32 -1.442695, %v277_v60  ;;  %v1804_v8 = vmul.f32 -1.442695, %v276_v0 }
  0x88   : > { %v2058_v14 = vpop.eup %2057  ;;  %1262 = vperm.xlu1 %1844, %v1004_v9   ;;  %v592_v15 = vadd.f32 1.0, %v2056_v11  ;;  %2077 = vpow2.f32 %v1797_v7  ;;  %v1008_v27 = vld [vmem:[#allocation2 + $0x178] sm:$0xff]  ;;  %v281_v9 = vld [vmem:[%s2245_s17 + $0x268] sm:$0xff] }
  0x89   : > { %v2060_v16 = vpop.eup %2059  ;;  %2079 = vrcp.f32 %v593_v13  ;;  %v595_v18 = vadd.f32 1.0, %v2058_v14  ;;  %v1007_v32 = vld [vmem:[#allocation2 + $0x170] sm:$0xff]  ;;  %v280_v13 = vld [vmem:[%s2245_s17 + $0x260] sm:$0xff]  ;;  %v287_v0 = vld [vmem:[%s2245_s17 + $0x298] sm:$0xff] }
  0x8a   : > { %v2062_v19 = vpop.eup %2061  ;;  %1257 = vperm.xlu0 %1843, %v1003_v12   ;;  %2081 = vrcp.f32 %v592_v15  ;;  %v594_v20 = vadd.f32 1.0, %v2060_v16  ;;  %v1010_v39 = vld [vmem:[#allocation2 + $0x188] sm:$0xff]  ;;  %v1807_v12 = vmul.f32 -1.442695, %v279_v3  ;;  %v1806_v16 = vmul.f32 -1.442695, %v278_v6 }
  0x8b   : > { %v2064_v21 = vpop.eup %2063  ;;  %2083 = vrcp.f32 %v595_v18  ;;  %v597_v23 = vadd.f32 1.0, %v2062_v19  ;;  %v1009_v47 = vld [vmem:[#allocation2 + $0x180] sm:$0xff]  ;;  %v1809_v19 = vmul.f32 -1.442695, %v281_v9  ;;  %v286_v3 = vld [vmem:[%s2245_s17 + $0x290] sm:$0xff] }
  0x8c   : > { %v2066_v24 = vpop.eup %2065  ;;  %1272 = vperm.xlu1 %1844, %v1006_v17   ;;  %2085 = vrcp.f32 %v594_v20  ;;  %v596_v25 = vadd.f32 1.0, %v2064_v21  ;;  %v1012_v55 = vld [vmem:[#allocation2 + $0x198] sm:$0xff]  ;;  %v1808_v21 = vmul.f32 -1.442695, %v280_v13 }
  0x8d   : > { %v2068_v26 = vpop.eup %2067  ;;  %2087 = vrcp.f32 %v597_v23  ;;  %v599_v28 = vadd.f32 1.0, %v2066_v24  ;;  %v1011_v62 = vld [vmem:[#allocation2 + $0x190] sm:$0xff] }
  0x8e   : > { %v2070_v29 = vpop.eup %2069  ;;  %1267 = vperm.xlu0 %1843, %v1005_v22   ;;  %2089 = vrcp.f32 %v596_v25  ;;  %v598_v30 = vadd.f32 1.0, %v2068_v26 }
  0x8f   : > { %v2072_v31 = vpop.eup %2071  ;;  %2091 = vrcp.f32 %v599_v28  ;;  %v601_v33 = vadd.f32 1.0, %v2070_v29 }
  0x90   : > { %v2074_v35 = vpop.eup %2073  ;;  %1282 = vperm.xlu1 %1844, %v1008_v27   ;;  %2093 = vrcp.f32 %v598_v30  ;;  %v600_v36 = vadd.f32 1.0, %v2072_v31 }
  0x91   : > { %v2076_v38 = vpop.eup %2075  ;;  %2095 = vrcp.f32 %v601_v33  ;;  %v603_v40 = vadd.f32 1.0, %v2074_v35 }
  0x92   : > { %v2078_v42 = vpop.eup %2077  ;;  %1277 = vperm.xlu0 %1843, %v1007_v32   ;;  %2097 = vrcp.f32 %v600_v36  ;;  %v602_v43 = vadd.f32 1.0, %v2076_v38 }
  0x93   : > { %v2080_v46 = vpop.eup %2079  ;;  %2099 = vrcp.f32 %v603_v40  ;;  %v605_v48 = vadd.f32 1.0, %v2078_v42 }
  0x94   : > { %v2082_v51 = vpop.eup %2081  ;;  %1292 = vperm.xlu1 %1844, %v1010_v39   ;;  %846 = vst.msk [vmem:[#allocation2 + $0x1a8] sm:$0xff] %vm792_vm0, %v2080_v46  ;;  %2101 = vrcp.f32 %v602_v43 }
  0x95   : > { %v2084_v54 = vpop.eup %2083  ;;  %845 = vst.msk [vmem:[#allocation2 + $0x1a0] sm:$0xff] %vm792_vm0, %v2082_v51  ;;  %2103 = vrcp.f32 %v605_v48  ;;  %v283_v48 = vld [vmem:[%s2245_s17 + $0x278] sm:$0xff]  ;;  %v282_v51 = vld [vmem:[%s2245_s17 + $0x270] sm:$0xff] }
  0x96   : > { %v2086_v58 = vpop.eup %2085  ;;  %1287 = vperm.xlu0 %1843, %v1009_v47   ;;  %848 = vst.msk [vmem:[#allocation2 + $0x1b8] sm:$0xff] %vm792_vm0, %v2084_v54  ;;  %2105 = vpow2.f32 %v1796_v44 }
  0x97   : > { %v2088_v61 = vpop.eup %2087  ;;  %847 = vst.msk [vmem:[#allocation2 + $0x1b0] sm:$0xff] %vm792_vm0, %v2086_v58  ;;  %2107 = vpow2.f32 %v1799_v49  ;;  %v1811_v58 = vmul.f32 -1.442695, %v283_v48 }
  0x98   : > { %v2090_v1 = vpop.eup %2089  ;;  %1302 = vperm.xlu1 %1844, %v1012_v55   ;;  %850 = vst.msk [vmem:[#allocation2 + $0x1c8] sm:$0xff] %vm792_vm0, %v2088_v61  ;;  %2109 = vpow2.f32 %v1798_v52  ;;  %v285_v55 = vld [vmem:[%s2245_s17 + $0x288] sm:$0xff] }
  0x99   : > { %v2092_v4 = vpop.eup %2091  ;;  %849 = vst.msk [vmem:[#allocation2 + $0x1c0] sm:$0xff] %vm792_vm0, %v2090_v1  ;;  %2111 = vpow2.f32 %v1801_v56 }
  0x9a   : > { %v2094_v7 = vpop.eup %2093  ;;  %1297 = vperm.xlu0 %1843, %v1011_v62   ;;  %852 = vst.msk [vmem:[#allocation2 + $0x1d8] sm:$0xff] %vm792_vm0, %v2092_v4  ;;  %2113 = vpow2.f32 %v1800_v59  ;;  %v284_v59 = vld [vmem:[%s2245_s17 + $0x280] sm:$0xff] }
  0x9b   : > { %v2096_v10 = vpop.eup %2095  ;;  %v1014_v11 = vld [vmem:[#allocation2 + $0x1a8] sm:$0xff]  ;;  %851 = vst.msk [vmem:[#allocation2 + $0x1d0] sm:$0xff] %vm792_vm0, %v2094_v7  ;;  %2115 = vpow2.f32 %v1803_v63  ;;  %v1810_v63 = vmul.f32 -1.442695, %v282_v51  ;;  %v1812_v6 = vmul.f32 -1.442695, %v284_v59 }
  0x9c   : > { %v2098_v14 = vpop.eup %2097  ;;  %1312 = vperm.xlu1 %1844, %v1014_v11   ;;  %v1013_v15 = vld [vmem:[#allocation2 + $0x1a0] sm:$0xff]  ;;  %854 = vst.msk [vmem:[#allocation2 + $0x1e8] sm:$0xff] %vm792_vm0, %v2096_v10  ;;  %2117 = vpow2.f32 %v1802_v2  ;;  %v1813_v2 = vmul.f32 -1.442695, %v285_v55  ;;  %v879_v10 = vld [vmem:[%s2399_s20 + $0x10] sm:$0xff] }
  0x9d   : > { %v2100_v17 = vpop.eup %2099  ;;  %v1016_v18 = vld [vmem:[#allocation2 + $0x1b8] sm:$0xff]  ;;  %853 = vst.msk [vmem:[#allocation2 + $0x1e0] sm:$0xff] %vm792_vm0, %v2098_v14  ;;  %2119 = vpow2.f32 %v1805_v5  ;;  %v877_v14 = vld [vmem:[%s2399_s20] sm:$0xff] }
  0x9e   : > { %v2102_v20 = vpop.eup %2101  ;;  %1307 = vperm.xlu0 %1843, %v1013_v15   ;;  %856 = vst.msk [vmem:[#allocation2 + $0x1f8] sm:$0xff] %vm792_vm0, %v2100_v17  ;;  %2121 = vpow2.f32 %v1804_v8  ;;  %v1015_v23 = vld [vmem:[#allocation2 + $0x1b0] sm:$0xff]  ;;  %v1815_v8 = vmul.f32 -1.442695, %v287_v0 }
  0x9f   : > { %v2104_v22 = vpop.eup %2103  ;;  %855 = vst.msk [vmem:[#allocation2 + $0x1f0] sm:$0xff] %vm792_vm0, %v2102_v20  ;;  %2123 = vpow2.f32 %v1807_v12  ;;  %v1018_v26 = vld [vmem:[#allocation2 + $0x1c8] sm:$0xff]  ;;  %v1814_v12 = vmul.f32 -1.442695, %v286_v3 }
  0xa0   : > { %v2106_v24 = vpop.eup %2105  ;;  %1322 = vperm.xlu1 %1844, %v1016_v18   ;;  %858 = vst.msk [vmem:[#allocation2 + $0x208] sm:$0xff] %vm792_vm0, %v2104_v22  ;;  %2125 = vpow2.f32 %v1806_v16  ;;  %v1017_v31 = vld [vmem:[#allocation2 + $0x1c0] sm:$0xff] }
  0xa1   : > { %v2108_v25 = vpop.eup %2107  ;;  %v604_v27 = vadd.f32 1.0, %v2106_v24  ;;  %2127 = vpow2.f32 %v1809_v19  ;;  %v1020_v36 = vld [vmem:[#allocation2 + $0x1d8] sm:$0xff] }
  0xa2   : > { %v2110_v28 = vpop.eup %2109  ;;  %1317 = vperm.xlu0 %1843, %v1015_v23   ;;  %v607_v29 = vadd.f32 1.0, %v2108_v25  ;;  %2129 = vpow2.f32 %v1808_v21  ;;  %v1019_v41 = vld [vmem:[#allocation2 + $0x1d0] sm:$0xff]  ;;  %v880_v23 = vld [vmem:[%s2399_s20 + $0x18] sm:$0xff]  ;;  %v878_v25 = vld [vmem:[%s2399_s20 + $0x8] sm:$0xff] }
  0xa3   : > { %v2112_v30 = vpop.eup %2111  ;;  %2131 = vrcp.f32 %v604_v27  ;;  %v606_v32 = vadd.f32 1.0, %v2110_v28  ;;  %v1022_v46 = vld [vmem:[#allocation2 + $0x1e8] sm:$0xff] }
  0xa4   : > { %v2114_v33 = vpop.eup %2113  ;;  %1332 = vperm.xlu1 %1844, %v1018_v26   ;;  %2133 = vrcp.f32 %v607_v29  ;;  %v609_v34 = vadd.f32 1.0, %v2112_v30  ;;  %v1021_v53 = vld [vmem:[#allocation2 + $0x1e0] sm:$0xff] }
  0xa5   : > { %v2116_v35 = vpop.eup %2115  ;;  %2135 = vrcp.f32 %v606_v32  ;;  %v608_v37 = vadd.f32 1.0, %v2114_v33  ;;  %v1024_v61 = vld [vmem:[#allocation2 + $0x1f8] sm:$0xff] }
  0xa6   : > { %v2118_v38 = vpop.eup %2117  ;;  %1327 = vperm.xlu0 %1843, %v1017_v31   ;;  %2137 = vrcp.f32 %v609_v34  ;;  %v611_v39 = vadd.f32 1.0, %v2116_v35  ;;  %v1023_v5 = vld [vmem:[#allocation2 + $0x1f0] sm:$0xff]  ;;  %v882_v35 = vld [vmem:[%s2399_s20 + $0x28] sm:$0xff] }
  0xa7   : > { %v2120_v40 = vpop.eup %2119  ;;  %2139 = vrcp.f32 %v608_v37  ;;  %v610_v42 = vadd.f32 1.0, %v2118_v38  ;;  %v1026_v11 = vld [vmem:[#allocation2 + $0x208] sm:$0xff]  ;;  %v881_v38 = vld [vmem:[%s2399_s20 + $0x20] sm:$0xff] }
  0xa8   : > { %v2122_v43 = vpop.eup %2121  ;;  %1342 = vperm.xlu1 %1844, %v1020_v36   ;;  %2141 = vrcp.f32 %v611_v39  ;;  %v613_v44 = vadd.f32 1.0, %v2120_v40 }
  0xa9   : > { %v2124_v45 = vpop.eup %2123  ;;  %2143 = vrcp.f32 %v610_v42  ;;  %v612_v47 = vadd.f32 1.0, %v2122_v43 }
  0xaa   : > { %v2126_v49 = vpop.eup %2125  ;;  %1337 = vperm.xlu0 %1843, %v1019_v41   ;;  %2145 = vrcp.f32 %v613_v44  ;;  %v615_v50 = vadd.f32 1.0, %v2124_v45 }
  0xab   : > { %v2128_v52 = vpop.eup %2127  ;;  %2147 = vrcp.f32 %v612_v47  ;;  %v614_v54 = vadd.f32 1.0, %v2126_v49  ;;  %v884_v49 = vld [vmem:[%s2399_s20 + $0x38] sm:$0xff] }
  0xac   : > { %v2130_v56 = vpop.eup %2129  ;;  %1352 = vperm.xlu1 %1844, %v1022_v46   ;;  %2149 = vrcp.f32 %v615_v50  ;;  %v617_v57 = vadd.f32 1.0, %v2128_v52 }
  0xad   : > { %v2132_v60 = vpop.eup %2131  ;;  %2151 = vrcp.f32 %v614_v54  ;;  %v616_v62 = vadd.f32 1.0, %v2130_v56 }
  0xae   : > { %v2134_v1 = vpop.eup %2133  ;;  %1347 = vperm.xlu0 %1843, %v1021_v53   ;;  %857 = vst.msk [vmem:[#allocation2 + $0x200] sm:$0xff] %vm792_vm0, %v2132_v60  ;;  %2153 = vrcp.f32 %v617_v57  ;;  %v883_v53 = vld [vmem:[%s2399_s20 + $0x30] sm:$0xff] }
  0xaf   : > { %v2136_v4 = vpop.eup %2135  ;;  %860 = vst.msk [vmem:[#allocation2 + $0x218] sm:$0xff] %vm792_vm0, %v2134_v1  ;;  %2155 = vrcp.f32 %v616_v62  ;;  %v885_v1 = vld [vmem:[%s2399_s20 + $0x40] sm:$0xff] }
  0xb0   : > { %v2138_v7 = vpop.eup %2137  ;;  %1362 = vperm.xlu1 %1844, %v1024_v61   ;;  %859 = vst.msk [vmem:[#allocation2 + $0x210] sm:$0xff] %vm792_vm0, %v2136_v4  ;;  %2157 = vpow2.f32 %v1811_v58 }
  0xb1   : > { %v2140_v9 = vpop.eup %2139  ;;  %862 = vst.msk [vmem:[#allocation2 + $0x228] sm:$0xff] %vm792_vm0, %v2138_v7  ;;  %2159 = vpow2.f32 %v1810_v63  ;;  %v886_v63 = vld [vmem:[%s2399_s20 + $0x48] sm:$0xff]  ;;  %v888_v7 = vld [vmem:[%s2399_s20 + $0x58] sm:$0xff] }
  0xb2   : > { %v2142_v13 = vpop.eup %2141  ;;  %1357 = vperm.xlu0 %1843, %v1023_v5   ;;  %861 = vst.msk [vmem:[#allocation2 + $0x220] sm:$0xff] %vm792_vm0, %v2140_v9  ;;  %2161 = vpow2.f32 %v1813_v2  ;;  %v887_v9 = vld [vmem:[%s2399_s20 + $0x50] sm:$0xff] }
  0xb3   : > { %v2144_v15 = vpop.eup %2143  ;;  %v1058_v16 = vpop.permute.xlu1 %1057  ;;  %864 = vst.msk [vmem:[#allocation2 + $0x238] sm:$0xff] %vm792_vm0, %v2142_v13  ;;  %2163 = vpow2.f32 %v1812_v6 }
  0xb4   : > { %v2146_v17 = vpop.eup %2145  ;;  %v1467_v18 = vmul.f32 %v1058_v16, %v879_v10  ;;  %v1048_v19 = vpop.permute.xlu0 %1047  ;;  %1372 = vperm.xlu1 %1844, %v1026_v11   ;;  %863 = vst.msk [vmem:[#allocation2 + $0x230] sm:$0xff] %vm792_vm0, %v2144_v15  ;;  %2165 = vpow2.f32 %v1815_v8 }
  0xb5   : > { %v2148_v20 = vpop.eup %2147  ;;  %v1465_v21 = vmul.f32 %v1048_v19, %v877_v14  ;;  %v1025_v22 = vld [vmem:[#allocation2 + $0x200] sm:$0xff]  ;;  %866 = vst.msk [vmem:[#allocation2 + $0x248] sm:$0xff] %vm792_vm0, %v2146_v17  ;;  %2167 = vpow2.f32 %v1814_v12 }
  0xb6   : > { %v2150_v24 = vpop.eup %2149  ;;  %1552 = vst.msk [vmem:[%s2413_s23 + $0x10] sm:$0xff] %vm1549_vm1, %v1467_v18  ;;  %1367 = vperm.xlu0 %1843, %v1025_v22   ;;  %v1028_v26 = vld [vmem:[#allocation2 + $0x218] sm:$0xff]  ;;  %v890_v18 = vld [vmem:[%s2399_s20 + $0x68] sm:$0xff] }
  0xb7   : > { %865 = vst.msk [vmem:[#allocation2 + $0x240] sm:$0xff] %vm792_vm0, %v2148_v20  ;;  %v2152_v27 = vpop.eup %2151  ;;  %v1063_v28 = vpop.permute.xlu1 %1062  ;;  %v1027_v29 = vld [vmem:[#allocation2 + $0x210] sm:$0xff]  ;;  %868 = vst.msk [vmem:[#allocation2 + $0x258] sm:$0xff] %vm792_vm0, %v2150_v24 }
  0xb8   : > { %1550 = vst.msk [vmem:[%s2413_s23] sm:$0xff] %vm1549_vm1, %v1465_v21  ;;  %v2154_v30 = vpop.eup %2153  ;;  %v1468_v31 = vmul.f32 %v1063_v28, %v880_v23  ;;  %v1053_v32 = vpop.permute.xlu0 %1052  ;;  %1382 = vperm.xlu1 %1844, %v1028_v26   ;;  %v1030_v36 = vld [vmem:[#allocation2 + $0x228] sm:$0xff]  ;;  %v889_v23 = vld [vmem:[%s2399_s20 + $0x60] sm:$0xff]  ;;  %v892_v28 = vld [vmem:[%s2399_s20 + $0x78] sm:$0xff] }
  0xb9   : > { %867 = vst.msk [vmem:[#allocation2 + $0x250] sm:$0xff] %vm792_vm0, %v2152_v27  ;;  %v2156_v33 = vpop.eup %2155  ;;  %v1466_v34 = vmul.f32 %v1053_v32, %v878_v25  ;;  %870 = vst.msk [vmem:[#allocation2 + $0x268] sm:$0xff] %vm792_vm0, %v2154_v30  ;;  %v1029_v41 = vld [vmem:[#allocation2 + $0x220] sm:$0xff] }
  0xba   : > { %v2158_v37 = vpop.eup %2157  ;;  %1553 = vst.msk [vmem:[%s2413_s23 + $0x18] sm:$0xff] %vm1549_vm1, %v1468_v31  ;;  %1377 = vperm.xlu0 %1843, %v1027_v29   ;;  %v1032_v50 = vld [vmem:[#allocation2 + $0x238] sm:$0xff]  ;;  %v891_v31 = vld [vmem:[%s2399_s20 + $0x70] sm:$0xff] }
  0xbb   : > { %869 = vst.msk [vmem:[#allocation2 + $0x260] sm:$0xff] %vm792_vm0, %v2156_v33  ;;  %v2160_v39 = vpop.eup %2159  ;;  %v1073_v40 = vpop.permute.xlu1 %1072  ;;  %v619_v42 = vadd.f32 1.0, %v2158_v37  ;;  %v1031_v57 = vld [vmem:[#allocation2 + $0x230] sm:$0xff] }
  0xbc   : > { %1551 = vst.msk [vmem:[%s2413_s23 + $0x8] sm:$0xff] %vm1549_vm1, %v1466_v34  ;;  %v2162_v43 = vpop.eup %2161  ;;  %v1470_v44 = vmul.f32 %v1073_v40, %v882_v35  ;;  %v1068_v45 = vpop.permute.xlu0 %1067  ;;  %1392 = vperm.xlu1 %1844, %v1030_v36   ;;  %v618_v46 = vadd.f32 1.0, %v2160_v39  ;;  %v1034_v0 = vld [vmem:[#allocation2 + $0x248] sm:$0xff]  ;;  %v893_v40 = vld [vmem:[%s2399_s20 + $0x80] sm:$0xff] }
  0xbd   : > { %v2164_v47 = vpop.eup %2163  ;;  %v1469_v48 = vmul.f32 %v1068_v45, %v881_v38  ;;  %2169 = vrcp.f32 %v619_v42  ;;  %v621_v51 = vadd.f32 1.0, %v2162_v43  ;;  %v894_v36 = vld [vmem:[%s2399_s20 + $0x88] sm:$0xff] }
  0xbe   : > { %v2166_v52 = vpop.eup %2165  ;;  %1555 = vst.msk [vmem:[%s2413_s23 + $0x28] sm:$0xff] %vm1549_vm1, %v1470_v44  ;;  %1387 = vperm.xlu0 %1843, %v1029_v41   ;;  %2171 = vrcp.f32 %v618_v46  ;;  %v620_v54 = vadd.f32 1.0, %v2164_v47  ;;  %v1033_v3 = vld [vmem:[#allocation2 + $0x240] sm:$0xff]  ;;  %v1036_v8 = vld [vmem:[#allocation2 + $0x258] sm:$0xff] }
  0xbf   : > { %v2168_v55 = vpop.eup %2167  ;;  %1554 = vst.msk [vmem:[%s2413_s23 + $0x20] sm:$0xff] %vm1549_vm1, %v1469_v48  ;;  %v1083_v56 = vpop.permute.xlu1 %1082  ;;  %2173 = vrcp.f32 %v621_v51  ;;  %v623_v58 = vadd.f32 1.0, %v2166_v52  ;;  %v896_v44 = vld [vmem:[%s2399_s20 + $0x98] sm:$0xff]  ;;  %v895_v48 = vld [vmem:[%s2399_s20 + $0x90] sm:$0xff]  ;;  %v898_v52 = vld [vmem:[%s2399_s20 + $0xa8] sm:$0xff] }
  0xc0   : > { %v1472_v59 = vmul.f32 %v1083_v56, %v884_v49  ;;  %v1078_v60 = vpop.permute.xlu0 %1077  ;;  %1402 = vperm.xlu1 %1844, %v1032_v50   ;;  %2175 = vrcp.f32 %v620_v54  ;;  %v622_v61 = vadd.f32 1.0, %v2168_v55  ;;  %v1035_v12 = vld [vmem:[#allocation2 + $0x250] sm:$0xff]  ;;  %v1038_v19 = vld [vmem:[#allocation2 + $0x268] sm:$0xff]  ;;  %v897_v55 = vld [vmem:[%s2399_s20 + $0xa0] sm:$0xff] }
  0xc1   : > { %v1471_v62 = vmul.f32 %v1078_v60, %v883_v53  ;;  %2177 = vrcp.f32 %v623_v58  ;;  %v900_v58 = vld [vmem:[%s2399_s20 + $0xb8] sm:$0xff] }
  0xc2   : > { %1557 = vst.msk [vmem:[%s2413_s23 + $0x38] sm:$0xff] %vm1549_vm1, %v1472_v59  ;;  %1397 = vperm.xlu0 %1843, %v1031_v57   ;;  %2179 = vrcp.f32 %v622_v61  ;;  %v1037_v24 = vld [vmem:[#allocation2 + $0x260] sm:$0xff]  ;;  %v899_v61 = vld [vmem:[%s2399_s20 + $0xb0] sm:$0xff] }
  0xc3   : > { %1556 = vst.msk [vmem:[%s2413_s23 + $0x30] sm:$0xff] %vm1549_vm1, %v1471_v62  ;;  %v1093_v2 = vpop.permute.xlu1 %1092 }
  0xc4   : > { %v1474_v4 = vmul.f32 %v1093_v2, %v886_v63  ;;  %v1088_v5 = vpop.permute.xlu0 %1087  ;;  %1412 = vperm.xlu1 %1844, %v1034_v0   ;;  %v902_v0 = vld [vmem:[%s2399_s20 + $0xc8] sm:$0xff] }
  0xc5   : > { %v1473_v6 = vmul.f32 %v1088_v5, %v885_v1 }
  0xc6   : > { %1559 = vst.msk [vmem:[%s2413_s23 + $0x48] sm:$0xff] %vm1549_vm1, %v1474_v4  ;;  %1407 = vperm.xlu0 %1843, %v1033_v3   ;;  %v901_v3 = vld [vmem:[%s2399_s20 + $0xc0] sm:$0xff] }
  0xc7   : > { %v2170_v10 = vpop.eup %2169  ;;  %1558 = vst.msk [vmem:[%s2413_s23 + $0x40] sm:$0xff] %vm1549_vm1, %v1473_v6  ;;  %v1103_v11 = vpop.permute.xlu1 %1102  ;;  %v904_v6 = vld [vmem:[%s2399_s20 + $0xd8] sm:$0xff] }
  0xc8   : > { %v2172_v13 = vpop.eup %2171  ;;  %v1476_v14 = vmul.f32 %v1103_v11, %v888_v7  ;;  %v1098_v15 = vpop.permute.xlu0 %1097  ;;  %1422 = vperm.xlu1 %1844, %v1036_v8   ;;  %872 = vst.msk [vmem:[#allocation2 + $0x278] sm:$0xff] %vm792_vm0, %v2170_v10 }
  0xc9   : > { %v2174_v16 = vpop.eup %2173  ;;  %v1475_v17 = vmul.f32 %v1098_v15, %v887_v9  ;;  %871 = vst.msk [vmem:[#allocation2 + $0x270] sm:$0xff] %vm792_vm0, %v2172_v13  ;;  %v903_v9 = vld [vmem:[%s2399_s20 + $0xd0] sm:$0xff]  ;;  %v905_v15 = vld [vmem:[%s2399_s20 + $0xe0] sm:$0xff] }
  0xca   : > { %v2176_v20 = vpop.eup %2175  ;;  %1561 = vst.msk [vmem:[%s2413_s23 + $0x58] sm:$0xff] %vm1549_vm1, %v1476_v14  ;;  %1417 = vperm.xlu0 %1843, %v1035_v12   ;;  %v906_v12 = vld [vmem:[%s2399_s20 + $0xe8] sm:$0xff] }
  0xcb   : > { %874 = vst.msk [vmem:[#allocation2 + $0x288] sm:$0xff] %vm792_vm0, %v2174_v16  ;;  %v2178_v21 = vpop.eup %2177  ;;  %v1113_v22 = vpop.permute.xlu1 %1112  ;;  %873 = vst.msk [vmem:[#allocation2 + $0x280] sm:$0xff] %vm792_vm0, %v2176_v20 }
  0xcc   : > { %1560 = vst.msk [vmem:[%s2413_s23 + $0x50] sm:$0xff] %vm1549_vm1, %v1475_v17  ;;  %v2180_v25 = vpop.eup %2179  ;;  %v1478_v26 = vmul.f32 %v1113_v22, %v890_v18  ;;  %1432 = vperm.xlu1 %1844, %v1038_v19   ;;  %v908_v18 = vld [vmem:[%s2399_s20 + $0xf8] sm:$0xff] }
  0xcd   : > { %876 = vst.msk [vmem:[#allocation2 + $0x298] sm:$0xff] %vm792_vm0, %v2178_v21  ;;  %v1108_v27 = vpop.permute.xlu0 %1107  ;;  %875 = vst.msk [vmem:[#allocation2 + $0x290] sm:$0xff] %vm792_vm0, %v2180_v25  ;;  %v907_v21 = vld [vmem:[%s2399_s20 + $0xf0] sm:$0xff] }
  0xce   : > { %1563 = vst.msk [vmem:[%s2413_s23 + $0x68] sm:$0xff] %vm1549_vm1, %v1478_v26  ;;  %v1477_v29 = vmul.f32 %v1108_v27, %v889_v23  ;;  %1427 = vperm.xlu0 %1843, %v1037_v24   ;;  %v910_v24 = vld [vmem:[%s2399_s20 + $0x108] sm:$0xff]  ;;  %v909_v27 = vld [vmem:[%s2399_s20 + $0x100] sm:$0xff] }
  0xcf   : > { %v1123_v30 = vpop.permute.xlu1 %1122  ;;  %v1040_v32 = vld [vmem:[#allocation2 + $0x278] sm:$0xff] }
  0xd0   : > { %1562 = vst.msk [vmem:[%s2413_s23 + $0x60] sm:$0xff] %vm1549_vm1, %v1477_v29  ;;  %v1480_v33 = vmul.f32 %v1123_v30, %v892_v28  ;;  %1442 = vperm.xlu1 %1844, %v1040_v32   ;;  %v1039_v34 = vld [vmem:[#allocation2 + $0x270] sm:$0xff]  ;;  %v912_v30 = vld [vmem:[%s2399_s20 + $0x118] sm:$0xff] }
  0xd1   : > { %v1118_v35 = vpop.permute.xlu0 %1117 }
  0xd2   : > { %v1042_v37 = vld [vmem:[#allocation2 + $0x288] sm:$0xff]  ;;  %1565 = vst.msk [vmem:[%s2413_s23 + $0x78] sm:$0xff] %vm1549_vm1, %v1480_v33  ;;  %v1479_v38 = vmul.f32 %v1118_v35, %v891_v31  ;;  %1437 = vperm.xlu0 %1843, %v1039_v34   ;;  %v1041_v41 = vld [vmem:[#allocation2 + $0x280] sm:$0xff]  ;;  %v911_v33 = vld [vmem:[%s2399_s20 + $0x110] sm:$0xff] }
  0xd3   : > { %v1133_v39 = vpop.permute.xlu1 %1132 }
  0xd4   : > { %1564 = vst.msk [vmem:[%s2413_s23 + $0x70] sm:$0xff] %vm1549_vm1, %v1479_v38  ;;  %v1482_v42 = vmul.f32 %v1133_v39, %v894_v36  ;;  %1452 = vperm.xlu1 %1844, %v1042_v37   ;;  %v1044_v45 = vld [vmem:[#allocation2 + $0x298] sm:$0xff]  ;;  %v1043_v49 = vld [vmem:[#allocation2 + $0x290] sm:$0xff]  ;;  %v914_v36 = vld [vmem:[%s2399_s20 + $0x128] sm:$0xff] }
  0xd5   : > { %v1128_v43 = vpop.permute.xlu0 %1127  ;;  %v913_v39 = vld [vmem:[%s2399_s20 + $0x120] sm:$0xff] }
  0xd6   : > { %1567 = vst.msk [vmem:[%s2413_s23 + $0x88] sm:$0xff] %vm1549_vm1, %v1482_v42  ;;  %v1481_v46 = vmul.f32 %v1128_v43, %v893_v40  ;;  %1447 = vperm.xlu0 %1843, %v1041_v41   ;;  %v916_v42 = vld [vmem:[%s2399_s20 + $0x138] sm:$0xff] }
  0xd7   : > { %v1143_v47 = vpop.permute.xlu1 %1142 }
  0xd8   : > { %1566 = vst.msk [vmem:[%s2413_s23 + $0x80] sm:$0xff] %vm1549_vm1, %v1481_v46  ;;  %v1484_v50 = vmul.f32 %v1143_v47, %v896_v44  ;;  %1462 = vperm.xlu1 %1844, %v1044_v45   ;;  %v915_v45 = vld [vmem:[%s2399_s20 + $0x130] sm:$0xff] }
  0xd9   : > { %v1138_v51 = vpop.permute.xlu0 %1137 }
  0xda   : > { %1569 = vst.msk [vmem:[%s2413_s23 + $0x98] sm:$0xff] %vm1549_vm1, %v1484_v50  ;;  %v1483_v53 = vmul.f32 %v1138_v51, %v895_v48  ;;  %1457 = vperm.xlu0 %1843, %v1043_v49   ;;  %v918_v48 = vld [vmem:[%s2399_s20 + $0x148] sm:$0xff]  ;;  %v917_v51 = vld [vmem:[%s2399_s20 + $0x140] sm:$0xff] }
  0xdb   : > { %v1153_v54 = vpop.permute.xlu1 %1152 }
  0xdc   : > { %1568 = vst.msk [vmem:[%s2413_s23 + $0x90] sm:$0xff] %vm1549_vm1, %v1483_v53  ;;  %v1486_v56 = vmul.f32 %v1153_v54, %v898_v52  ;;  %v920_v54 = vld [vmem:[%s2399_s20 + $0x158] sm:$0xff] }
  0xdd   : > { %v1148_v57 = vpop.permute.xlu0 %1147 }
  0xde   : > { %1571 = vst.msk [vmem:[%s2413_s23 + $0xa8] sm:$0xff] %vm1549_vm1, %v1486_v56  ;;  %v1485_v59 = vmul.f32 %v1148_v57, %v897_v55  ;;  %v919_v57 = vld [vmem:[%s2399_s20 + $0x150] sm:$0xff] }
  0xdf   : > { %v1163_v60 = vpop.permute.xlu1 %1162 }
  0xe0   : > { %1570 = vst.msk [vmem:[%s2413_s23 + $0xa0] sm:$0xff] %vm1549_vm1, %v1485_v59  ;;  %v1488_v62 = vmul.f32 %v1163_v60, %v900_v58  ;;  %v922_v60 = vld [vmem:[%s2399_s20 + $0x168] sm:$0xff] }
  0xe1   : > { %v1158_v63 = vpop.permute.xlu0 %1157 }
  0xe2   : > { %1573 = vst.msk [vmem:[%s2413_s23 + $0xb8] sm:$0xff] %vm1549_vm1, %v1488_v62  ;;  %v1487_v1 = vmul.f32 %v1158_v63, %v899_v61  ;;  %v921_v63 = vld [vmem:[%s2399_s20 + $0x160] sm:$0xff] }
  0xe3   : > { %v1173_v2 = vpop.permute.xlu1 %1172 }
  0xe4   : > { %1572 = vst.msk [vmem:[%s2413_s23 + $0xb0] sm:$0xff] %vm1549_vm1, %v1487_v1  ;;  %v1490_v4 = vmul.f32 %v1173_v2, %v902_v0  ;;  %v924_v2 = vld [vmem:[%s2399_s20 + $0x178] sm:$0xff] }
  0xe5   : > { %v1168_v5 = vpop.permute.xlu0 %1167 }
  0xe6   : > { %1575 = vst.msk [vmem:[%s2413_s23 + $0xc8] sm:$0xff] %vm1549_vm1, %v1490_v4  ;;  %v1489_v7 = vmul.f32 %v1168_v5, %v901_v3  ;;  %v923_v5 = vld [vmem:[%s2399_s20 + $0x170] sm:$0xff] }
  0xe7   : > { %v1183_v8 = vpop.permute.xlu1 %1182 }
  0xe8   : > { %1574 = vst.msk [vmem:[%s2413_s23 + $0xc0] sm:$0xff] %vm1549_vm1, %v1489_v7  ;;  %v1492_v10 = vmul.f32 %v1183_v8, %v904_v6  ;;  %v926_v8 = vld [vmem:[%s2399_s20 + $0x188] sm:$0xff] }
  0xe9   : > { %v1178_v11 = vpop.permute.xlu0 %1177 }
  0xea   : > { %1577 = vst.msk [vmem:[%s2413_s23 + $0xd8] sm:$0xff] %vm1549_vm1, %v1492_v10  ;;  %v1491_v13 = vmul.f32 %v1178_v11, %v903_v9  ;;  %v925_v11 = vld [vmem:[%s2399_s20 + $0x180] sm:$0xff] }
  0xeb   : > { %v1193_v14 = vpop.permute.xlu1 %1192 }
  0xec   : > { %1576 = vst.msk [vmem:[%s2413_s23 + $0xd0] sm:$0xff] %vm1549_vm1, %v1491_v13  ;;  %v1494_v16 = vmul.f32 %v1193_v14, %v906_v12  ;;  %v928_v14 = vld [vmem:[%s2399_s20 + $0x198] sm:$0xff] }
  0xed   : > { %v1188_v17 = vpop.permute.xlu0 %1187 }
  0xee   : > { %1579 = vst.msk [vmem:[%s2413_s23 + $0xe8] sm:$0xff] %vm1549_vm1, %v1494_v16  ;;  %v1493_v19 = vmul.f32 %v1188_v17, %v905_v15  ;;  %v927_v17 = vld [vmem:[%s2399_s20 + $0x190] sm:$0xff] }
  0xef   : > { %v1203_v20 = vpop.permute.xlu1 %1202 }
  0xf0   : > { %1578 = vst.msk [vmem:[%s2413_s23 + $0xe0] sm:$0xff] %vm1549_vm1, %v1493_v19  ;;  %v1496_v22 = vmul.f32 %v1203_v20, %v908_v18  ;;  %v930_v20 = vld [vmem:[%s2399_s20 + $0x1a8] sm:$0xff] }
  0xf1   : > { %v1198_v23 = vpop.permute.xlu0 %1197 }
  0xf2   : > { %1581 = vst.msk [vmem:[%s2413_s23 + $0xf8] sm:$0xff] %vm1549_vm1, %v1496_v22  ;;  %v1495_v25 = vmul.f32 %v1198_v23, %v907_v21  ;;  %v929_v23 = vld [vmem:[%s2399_s20 + $0x1a0] sm:$0xff] }
  0xf3   : > { %v1213_v26 = vpop.permute.xlu1 %1212 }
  0xf4   : > { %1580 = vst.msk [vmem:[%s2413_s23 + $0xf0] sm:$0xff] %vm1549_vm1, %v1495_v25  ;;  %v1498_v28 = vmul.f32 %v1213_v26, %v910_v24  ;;  %v932_v26 = vld [vmem:[%s2399_s20 + $0x1b8] sm:$0xff] }
  0xf5   : > { %v1208_v29 = vpop.permute.xlu0 %1207 }
  0xf6   : > { %1583 = vst.msk [vmem:[%s2413_s23 + $0x108] sm:$0xff] %vm1549_vm1, %v1498_v28  ;;  %v1497_v31 = vmul.f32 %v1208_v29, %v909_v27  ;;  %v931_v29 = vld [vmem:[%s2399_s20 + $0x1b0] sm:$0xff] }
  0xf7   : > { %v1223_v32 = vpop.permute.xlu1 %1222 }
  0xf8   : > { %1582 = vst.msk [vmem:[%s2413_s23 + $0x100] sm:$0xff] %vm1549_vm1, %v1497_v31  ;;  %v1500_v34 = vmul.f32 %v1223_v32, %v912_v30  ;;  %v934_v32 = vld [vmem:[%s2399_s20 + $0x1c8] sm:$0xff] }
  0xf9   : > { %v1218_v35 = vpop.permute.xlu0 %1217 }
  0xfa   : > { %1585 = vst.msk [vmem:[%s2413_s23 + $0x118] sm:$0xff] %vm1549_vm1, %v1500_v34  ;;  %v1499_v37 = vmul.f32 %v1218_v35, %v911_v33  ;;  %v933_v35 = vld [vmem:[%s2399_s20 + $0x1c0] sm:$0xff] }
  0xfb   : > { %v1233_v38 = vpop.permute.xlu1 %1232 }
  0xfc   : > { %1584 = vst.msk [vmem:[%s2413_s23 + $0x110] sm:$0xff] %vm1549_vm1, %v1499_v37  ;;  %v1502_v40 = vmul.f32 %v1233_v38, %v914_v36  ;;  %v936_v38 = vld [vmem:[%s2399_s20 + $0x1d8] sm:$0xff] }
  0xfd   : > { %v1228_v41 = vpop.permute.xlu0 %1227 }
  0xfe   : > { %1587 = vst.msk [vmem:[%s2413_s23 + $0x128] sm:$0xff] %vm1549_vm1, %v1502_v40  ;;  %v1501_v43 = vmul.f32 %v1228_v41, %v913_v39  ;;  %v935_v41 = vld [vmem:[%s2399_s20 + $0x1d0] sm:$0xff] }
  0xff   : > { %v1243_v44 = vpop.permute.xlu1 %1242 }
 0x100   : > { %1586 = vst.msk [vmem:[%s2413_s23 + $0x120] sm:$0xff] %vm1549_vm1, %v1501_v43  ;;  %v1504_v46 = vmul.f32 %v1243_v44, %v916_v42  ;;  %v938_v44 = vld [vmem:[%s2399_s20 + $0x1e8] sm:$0xff] }
 0x101   : > { %v1238_v47 = vpop.permute.xlu0 %1237 }
 0x102   : > { %1589 = vst.msk [vmem:[%s2413_s23 + $0x138] sm:$0xff] %vm1549_vm1, %v1504_v46  ;;  %v1503_v49 = vmul.f32 %v1238_v47, %v915_v45  ;;  %v937_v47 = vld [vmem:[%s2399_s20 + $0x1e0] sm:$0xff] }
 0x103   : > { %v1253_v50 = vpop.permute.xlu1 %1252 }
 0x104   : > { %1588 = vst.msk [vmem:[%s2413_s23 + $0x130] sm:$0xff] %vm1549_vm1, %v1503_v49  ;;  %v1506_v52 = vmul.f32 %v1253_v50, %v918_v48  ;;  %v940_v50 = vld [vmem:[%s2399_s20 + $0x1f8] sm:$0xff] }
 0x105   : > { %v1248_v53 = vpop.permute.xlu0 %1247 }
 0x106   : > { %1591 = vst.msk [vmem:[%s2413_s23 + $0x148] sm:$0xff] %vm1549_vm1, %v1506_v52  ;;  %v1505_v55 = vmul.f32 %v1248_v53, %v917_v51  ;;  %v939_v53 = vld [vmem:[%s2399_s20 + $0x1f0] sm:$0xff] }
 0x107   : > { %v1263_v56 = vpop.permute.xlu1 %1262 }
 0x108   : > { %1590 = vst.msk [vmem:[%s2413_s23 + $0x140] sm:$0xff] %vm1549_vm1, %v1505_v55  ;;  %v1508_v58 = vmul.f32 %v1263_v56, %v920_v54  ;;  %v942_v56 = vld [vmem:[%s2399_s20 + $0x208] sm:$0xff] }
 0x109   : > { %v1258_v59 = vpop.permute.xlu0 %1257 }
 0x10a   : > { %1593 = vst.msk [vmem:[%s2413_s23 + $0x158] sm:$0xff] %vm1549_vm1, %v1508_v58  ;;  %v1507_v61 = vmul.f32 %v1258_v59, %v919_v57  ;;  %v941_v59 = vld [vmem:[%s2399_s20 + $0x200] sm:$0xff] }
 0x10b   : > { %v1273_v62 = vpop.permute.xlu1 %1272 }
 0x10c   : > { %1592 = vst.msk [vmem:[%s2413_s23 + $0x150] sm:$0xff] %vm1549_vm1, %v1507_v61  ;;  %v1510_v0 = vmul.f32 %v1273_v62, %v922_v60  ;;  %v944_v62 = vld [vmem:[%s2399_s20 + $0x218] sm:$0xff] }
 0x10d   : > { %v1268_v1 = vpop.permute.xlu0 %1267 }
 0x10e   : > { %1595 = vst.msk [vmem:[%s2413_s23 + $0x168] sm:$0xff] %vm1549_vm1, %v1510_v0  ;;  %v1509_v3 = vmul.f32 %v1268_v1, %v921_v63  ;;  %v943_v1 = vld [vmem:[%s2399_s20 + $0x210] sm:$0xff] }
 0x10f   : > { %v1283_v4 = vpop.permute.xlu1 %1282 }
 0x110   : > { %1594 = vst.msk [vmem:[%s2413_s23 + $0x160] sm:$0xff] %vm1549_vm1, %v1509_v3  ;;  %v1512_v6 = vmul.f32 %v1283_v4, %v924_v2  ;;  %v946_v4 = vld [vmem:[%s2399_s20 + $0x228] sm:$0xff] }
 0x111   : > { %v1278_v7 = vpop.permute.xlu0 %1277 }
 0x112   : > { %1597 = vst.msk [vmem:[%s2413_s23 + $0x178] sm:$0xff] %vm1549_vm1, %v1512_v6  ;;  %v1511_v9 = vmul.f32 %v1278_v7, %v923_v5  ;;  %v945_v7 = vld [vmem:[%s2399_s20 + $0x220] sm:$0xff] }
 0x113   : > { %v1293_v10 = vpop.permute.xlu1 %1292 }
 0x114   : > { %1596 = vst.msk [vmem:[%s2413_s23 + $0x170] sm:$0xff] %vm1549_vm1, %v1511_v9  ;;  %v1514_v12 = vmul.f32 %v1293_v10, %v926_v8  ;;  %v948_v10 = vld [vmem:[%s2399_s20 + $0x238] sm:$0xff] }
 0x115   : > { %v1288_v13 = vpop.permute.xlu0 %1287 }
 0x116   : > { %1599 = vst.msk [vmem:[%s2413_s23 + $0x188] sm:$0xff] %vm1549_vm1, %v1514_v12  ;;  %v1513_v15 = vmul.f32 %v1288_v13, %v925_v11  ;;  %v947_v13 = vld [vmem:[%s2399_s20 + $0x230] sm:$0xff] }
 0x117   : > { %v1303_v16 = vpop.permute.xlu1 %1302 }
 0x118   : > { %1598 = vst.msk [vmem:[%s2413_s23 + $0x180] sm:$0xff] %vm1549_vm1, %v1513_v15  ;;  %v1516_v18 = vmul.f32 %v1303_v16, %v928_v14  ;;  %v950_v16 = vld [vmem:[%s2399_s20 + $0x248] sm:$0xff] }
 0x119   : > { %v1298_v19 = vpop.permute.xlu0 %1297 }
 0x11a   : > { %1601 = vst.msk [vmem:[%s2413_s23 + $0x198] sm:$0xff] %vm1549_vm1, %v1516_v18  ;;  %v1515_v21 = vmul.f32 %v1298_v19, %v927_v17  ;;  %v949_v19 = vld [vmem:[%s2399_s20 + $0x240] sm:$0xff] }
 0x11b   : > { %v1313_v22 = vpop.permute.xlu1 %1312 }
 0x11c   : > { %1600 = vst.msk [vmem:[%s2413_s23 + $0x190] sm:$0xff] %vm1549_vm1, %v1515_v21  ;;  %v1518_v24 = vmul.f32 %v1313_v22, %v930_v20  ;;  %v952_v22 = vld [vmem:[%s2399_s20 + $0x258] sm:$0xff] }
 0x11d   : > { %v1308_v25 = vpop.permute.xlu0 %1307 }
 0x11e   : > { %1603 = vst.msk [vmem:[%s2413_s23 + $0x1a8] sm:$0xff] %vm1549_vm1, %v1518_v24  ;;  %v1517_v27 = vmul.f32 %v1308_v25, %v929_v23  ;;  %v951_v25 = vld [vmem:[%s2399_s20 + $0x250] sm:$0xff] }
 0x11f   : > { %v1323_v28 = vpop.permute.xlu1 %1322 }
 0x120   : > { %1602 = vst.msk [vmem:[%s2413_s23 + $0x1a0] sm:$0xff] %vm1549_vm1, %v1517_v27  ;;  %v1520_v30 = vmul.f32 %v1323_v28, %v932_v26  ;;  %v954_v28 = vld [vmem:[%s2399_s20 + $0x268] sm:$0xff] }
 0x121   : > { %v1318_v31 = vpop.permute.xlu0 %1317 }
 0x122   : > { %1605 = vst.msk [vmem:[%s2413_s23 + $0x1b8] sm:$0xff] %vm1549_vm1, %v1520_v30  ;;  %v1519_v33 = vmul.f32 %v1318_v31, %v931_v29  ;;  %v953_v31 = vld [vmem:[%s2399_s20 + $0x260] sm:$0xff] }
 0x123   : > { %v1333_v34 = vpop.permute.xlu1 %1332 }
 0x124   : > { %1604 = vst.msk [vmem:[%s2413_s23 + $0x1b0] sm:$0xff] %vm1549_vm1, %v1519_v33  ;;  %v1522_v36 = vmul.f32 %v1333_v34, %v934_v32  ;;  %v956_v34 = vld [vmem:[%s2399_s20 + $0x278] sm:$0xff] }
 0x125   : > { %v1328_v37 = vpop.permute.xlu0 %1327 }
 0x126   : > { %1607 = vst.msk [vmem:[%s2413_s23 + $0x1c8] sm:$0xff] %vm1549_vm1, %v1522_v36  ;;  %v1521_v39 = vmul.f32 %v1328_v37, %v933_v35  ;;  %v955_v37 = vld [vmem:[%s2399_s20 + $0x270] sm:$0xff] }
 0x127   : > { %v1343_v40 = vpop.permute.xlu1 %1342 }
 0x128   : > { %1606 = vst.msk [vmem:[%s2413_s23 + $0x1c0] sm:$0xff] %vm1549_vm1, %v1521_v39  ;;  %v1524_v42 = vmul.f32 %v1343_v40, %v936_v38  ;;  %v958_v40 = vld [vmem:[%s2399_s20 + $0x288] sm:$0xff] }
 0x129   : > { %v1338_v43 = vpop.permute.xlu0 %1337 }
 0x12a   : > { %1609 = vst.msk [vmem:[%s2413_s23 + $0x1d8] sm:$0xff] %vm1549_vm1, %v1524_v42  ;;  %v1523_v45 = vmul.f32 %v1338_v43, %v935_v41  ;;  %v957_v43 = vld [vmem:[%s2399_s20 + $0x280] sm:$0xff] }
 0x12b   : > { %v1353_v46 = vpop.permute.xlu1 %1352 }
 0x12c   : > { %1608 = vst.msk [vmem:[%s2413_s23 + $0x1d0] sm:$0xff] %vm1549_vm1, %v1523_v45  ;;  %v1526_v48 = vmul.f32 %v1353_v46, %v938_v44  ;;  %v960_v46 = vld [vmem:[%s2399_s20 + $0x298] sm:$0xff] }
 0x12d   : > { %v1348_v49 = vpop.permute.xlu0 %1347 }
 0x12e   : > { %1611 = vst.msk [vmem:[%s2413_s23 + $0x1e8] sm:$0xff] %vm1549_vm1, %v1526_v48  ;;  %v1525_v51 = vmul.f32 %v1348_v49, %v937_v47  ;;  %v959_v49 = vld [vmem:[%s2399_s20 + $0x290] sm:$0xff] }
 0x12f   : > { %v1363_v52 = vpop.permute.xlu1 %1362 }
 0x130   : > { %1610 = vst.msk [vmem:[%s2413_s23 + $0x1e0] sm:$0xff] %vm1549_vm1, %v1525_v51  ;;  %v1528_v54 = vmul.f32 %v1363_v52, %v940_v50 }
 0x131   : > { %v1358_v55 = vpop.permute.xlu0 %1357 }
 0x132   : > { %1613 = vst.msk [vmem:[%s2413_s23 + $0x1f8] sm:$0xff] %vm1549_vm1, %v1528_v54  ;;  %v1527_v57 = vmul.f32 %v1358_v55, %v939_v53 }
 0x133   : > { %v1373_v58 = vpop.permute.xlu1 %1372 }
 0x134   : > { %1612 = vst.msk [vmem:[%s2413_s23 + $0x1f0] sm:$0xff] %vm1549_vm1, %v1527_v57  ;;  %v1530_v60 = vmul.f32 %v1373_v58, %v942_v56 }
 0x135   : > { %v1368_v61 = vpop.permute.xlu0 %1367 }
 0x136   : > { %1615 = vst.msk [vmem:[%s2413_s23 + $0x208] sm:$0xff] %vm1549_vm1, %v1530_v60  ;;  %v1529_v63 = vmul.f32 %v1368_v61, %v941_v59 }
 0x137   : > { %v1383_v0 = vpop.permute.xlu1 %1382 }
 0x138   : > { %1614 = vst.msk [vmem:[%s2413_s23 + $0x200] sm:$0xff] %vm1549_vm1, %v1529_v63  ;;  %v1532_v2 = vmul.f32 %v1383_v0, %v944_v62 }
 0x139   : > { %v1378_v3 = vpop.permute.xlu0 %1377 }
 0x13a   : > { %1617 = vst.msk [vmem:[%s2413_s23 + $0x218] sm:$0xff] %vm1549_vm1, %v1532_v2  ;;  %v1531_v5 = vmul.f32 %v1378_v3, %v943_v1 }
 0x13b   : > { %v1393_v6 = vpop.permute.xlu1 %1392 }
 0x13c   : > { %1616 = vst.msk [vmem:[%s2413_s23 + $0x210] sm:$0xff] %vm1549_vm1, %v1531_v5  ;;  %v1534_v8 = vmul.f32 %v1393_v6, %v946_v4 }
 0x13d   : > { %v1388_v9 = vpop.permute.xlu0 %1387 }
 0x13e   : > { %1619 = vst.msk [vmem:[%s2413_s23 + $0x228] sm:$0xff] %vm1549_vm1, %v1534_v8  ;;  %v1533_v11 = vmul.f32 %v1388_v9, %v945_v7 }
 0x13f   : > { %v1403_v12 = vpop.permute.xlu1 %1402 }
 0x140   : > { %1618 = vst.msk [vmem:[%s2413_s23 + $0x220] sm:$0xff] %vm1549_vm1, %v1533_v11  ;;  %v1536_v14 = vmul.f32 %v1403_v12, %v948_v10 }
 0x141   : > { %v1398_v15 = vpop.permute.xlu0 %1397 }
 0x142   : > { %1621 = vst.msk [vmem:[%s2413_s23 + $0x238] sm:$0xff] %vm1549_vm1, %v1536_v14  ;;  %v1535_v17 = vmul.f32 %v1398_v15, %v947_v13 }
 0x143   : > { %v1413_v18 = vpop.permute.xlu1 %1412 }
 0x144   : > { %1620 = vst.msk [vmem:[%s2413_s23 + $0x230] sm:$0xff] %vm1549_vm1, %v1535_v17  ;;  %v1538_v20 = vmul.f32 %v1413_v18, %v950_v16 }
 0x145   : > { %v1408_v21 = vpop.permute.xlu0 %1407 }
 0x146   : > { %1623 = vst.msk [vmem:[%s2413_s23 + $0x248] sm:$0xff] %vm1549_vm1, %v1538_v20  ;;  %v1537_v23 = vmul.f32 %v1408_v21, %v949_v19 }
 0x147   : > { %v1423_v24 = vpop.permute.xlu1 %1422 }
 0x148   : > { %1622 = vst.msk [vmem:[%s2413_s23 + $0x240] sm:$0xff] %vm1549_vm1, %v1537_v23  ;;  %v1540_v26 = vmul.f32 %v1423_v24, %v952_v22 }
 0x149   : > { %v1418_v27 = vpop.permute.xlu0 %1417 }
 0x14a   : > { %1625 = vst.msk [vmem:[%s2413_s23 + $0x258] sm:$0xff] %vm1549_vm1, %v1540_v26  ;;  %v1539_v29 = vmul.f32 %v1418_v27, %v951_v25 }
 0x14b   : > { %v1433_v30 = vpop.permute.xlu1 %1432 }
 0x14c   : > { %1624 = vst.msk [vmem:[%s2413_s23 + $0x250] sm:$0xff] %vm1549_vm1, %v1539_v29  ;;  %v1542_v32 = vmul.f32 %v1433_v30, %v954_v28 }
 0x14d   : > { %v1428_v33 = vpop.permute.xlu0 %1427 }
 0x14e   : > { %1627 = vst.msk [vmem:[%s2413_s23 + $0x268] sm:$0xff] %vm1549_vm1, %v1542_v32  ;;  %v1541_v35 = vmul.f32 %v1428_v33, %v953_v31 }
 0x14f   : > { %v1443_v36 = vpop.permute.xlu1 %1442 }
 0x150   : > { %1626 = vst.msk [vmem:[%s2413_s23 + $0x260] sm:$0xff] %vm1549_vm1, %v1541_v35  ;;  %v1544_v38 = vmul.f32 %v1443_v36, %v956_v34 }
 0x151   : > { %v1438_v39 = vpop.permute.xlu0 %1437 }
 0x152   : > { %1629 = vst.msk [vmem:[%s2413_s23 + $0x278] sm:$0xff] %vm1549_vm1, %v1544_v38  ;;  %v1543_v41 = vmul.f32 %v1438_v39, %v955_v37 }
 0x153   : > { %v1453_v42 = vpop.permute.xlu1 %1452 }
 0x154   : > { %1628 = vst.msk [vmem:[%s2413_s23 + $0x270] sm:$0xff] %vm1549_vm1, %v1543_v41  ;;  %v1546_v44 = vmul.f32 %v1453_v42, %v958_v40 }
 0x155   : > { %v1448_v45 = vpop.permute.xlu0 %1447 }
 0x156   : > { %1631 = vst.msk [vmem:[%s2413_s23 + $0x288] sm:$0xff] %vm1549_vm1, %v1546_v44  ;;  %v1545_v47 = vmul.f32 %v1448_v45, %v957_v43 }
 0x157   : > { %v1463_v48 = vpop.permute.xlu1 %1462 }
 0x158   : > { %1630 = vst.msk [vmem:[%s2413_s23 + $0x280] sm:$0xff] %vm1549_vm1, %v1545_v47  ;;  %v1548_v50 = vmul.f32 %v1463_v48, %v960_v46 }
 0x159   : > { %v1458_v51 = vpop.permute.xlu0 %1457 }
 0x15a   : > { %1633 = vst.msk [vmem:[%s2413_s23 + $0x298] sm:$0xff] %vm1549_vm1, %v1548_v50  ;;  %v1547_v52 = vmul.f32 %v1458_v51, %v959_v49 }
 0x15c   : > { %1632 = vst.msk [vmem:[%s2413_s23 + $0x290] sm:$0xff] %vm1549_vm1, %v1547_v52 }
 0x15d PF: > { %s12_s11 = sadd.s32 1, %s2203_s11   ;;  %s2691_s9 = smov %s2199_s10 }
 0x15e   : > { %p9_p5 = scmp.ge.s32.totalorder %s12_s11, 4   ;;  %s2692_s10 = smov %s2694_s12 }
 0x160   :  { %11 = sbr.rel (!%p9_p5) target bundleno = 2 (0x2), region = 65 }

</bundles_post_ra>
